<compile_context>
chip_gen: v7x
topology: tpu7x:2x2x1
jax: 0.10.0
libtpu: 0.0.40
codegen_flags: <defaults>
</compile_context>

<pallas_src>
import jax
import jax.numpy as jnp
from jax.experimental import pallas as pl
from jax.experimental.pallas import tpu as pltpu

GATE_PAD = 128              # lanes per gate block: [r | z | n] each own a 128-lane block
MXU_DTYPE = jnp.bfloat16    # matmul-operand dtype (f32 accumulate, f32 elementwise math)


def gru2_kernel(x_ref, h0_ref,
                wih0_ref, whh0_ref, bi0_ref, bhn0_ref,
                wih1_ref, whh1_ref, bi1_ref, bhn1_ref,
                y_ref):
    """Fused 2-layer GRU over the whole sequence, batch-first in and out.

    x_ref    : (B, T, In) f32   batch-first input (native layout, no transpose)
    h0_ref   : (2, B, H)  f32   initial hidden state per layer
    wihK_ref : (rows, 3G) bf16  input weights, gate-major 128-lane blocks [r|z|n]
    whhK_ref : (G, 3G)    bf16  hidden weights, rows >= H are zero
    biK_ref  : (1, 3G)    f32   combined bias [b_ir+b_hr | b_iz+b_hz | b_in], gate-padded
    bhnK_ref : (1, G)     f32   b_hn (must stay inside the r* term), lane-padded
    y_ref    : (B, T, H)  f32   last layer's per-timestep hidden output, batch-first
    """
    B, T, In = x_ref.shape
    H = y_ref.shape[-1]
    G = bhn0_ref.shape[-1]          # 128 = per-gate lane block
    f32 = jnp.float32

    def sigmoid(v):
        # tanh-form sigmoid: one EUP transcendental per gate (no exp + divide).
        return 0.5 * jnp.tanh(0.5 * v) + 0.5

    def run_layer(gi_all, h, whh, bhn_row):
        # gi_all : (T*B, 3G) f32, time-major rows, input bias already folded in.
        # h      : (B, G)    f32, padded lanes [H:] are zero and stay zero.
        # whh    : (G, 3G)   bf16, rows [H:] zero, gate-major column blocks.
        # bhn_row: (1, G)    f32.
        bhn = jnp.broadcast_to(bhn_row, (B, G))                   # hoisted: ONE broadcast
        gi_steps = [gi_all[t * B:(t + 1) * B, :] for t in range(T)]  # off the chain
        outs = []
        for t in range(T):
            gi = gi_steps[t]
            # The ONLY op on the serial recurrence chain: one fused (B,G)x(G,3G) matmul.
            gh = jnp.dot(h.astype(MXU_DTYPE), whh, preferred_element_type=f32)  # (B, 3G)
            r = sigmoid(gi[:, 0:G] + gh[:, 0:G])
            z = sigmoid(gi[:, G:2 * G] + gh[:, G:2 * G])
            n = jnp.tanh(gi[:, 2 * G:3 * G] + r * (gh[:, 2 * G:3 * G] + bhn))
            h = (1.0 - z) * n + z * h
            outs.append(h)
        return outs

    # ---- build time-major (T*B, In) input using leading-dim ref loads only ----
    xb = [x_ref[b] for b in range(B)]                               # B x (T, In)
    x2d = jnp.concatenate(
        [xb[b][t:t + 1, :] for t in range(T) for b in range(B)], axis=0)  # (T*B, In)

    # ---- layer 0: ONE batched input-projection matmul for all timesteps ----
    gi0 = jnp.dot(x2d.astype(MXU_DTYPE), wih0_ref[...],
                  preferred_element_type=f32) + bi0_ref[...]         # (T*B, 3G)

    zpad = jnp.zeros((B, G - H), f32)
    h0_l0 = jnp.concatenate([h0_ref[0], zpad], axis=-1)              # (B, G)
    seq0 = run_layer(gi0, h0_l0, whh0_ref[...], bhn0_ref[...])

    # ---- layer 1: ONE batched input-projection matmul over layer-0 outputs ----
    s0 = jnp.concatenate(seq0, axis=0)                               # (T*B, G), time-major
    gi1 = jnp.dot(s0.astype(MXU_DTYPE), wih1_ref[...],
                  preferred_element_type=f32) + bi1_ref[...]          # (T*B, 3G)

    h0_l1 = jnp.concatenate([h0_ref[1], zpad], axis=-1)
    seq1 = run_layer(gi1, h0_l1, whh1_ref[...], bhn1_ref[...])

    # ---- write output batch-first (no wrapper transpose): one store per batch row ----
    for b in range(B):
        y_ref[b] = jnp.concatenate([seq1[t][b:b + 1, :H] for t in range(T)], axis=0)


def init_gru_params(key, input_size, hidden_size, num_layers):
    """PyTorch-style uniform(-1/sqrt(H), 1/sqrt(H)) init (PyTorch tensor layout)."""
    bound = 1.0 / jnp.sqrt(jnp.float32(hidden_size))
    params = []
    for layer in range(num_layers):
        in_sz = input_size if layer == 0 else hidden_size
        key, k1, k2, k3, k4 = jax.random.split(key, 5)
        w_ih = jax.random.uniform(k1, (3 * hidden_size, in_sz), jnp.float32, -bound, bound)
        w_hh = jax.random.uniform(k2, (3 * hidden_size, hidden_size), jnp.float32, -bound, bound)
        b_ih = jax.random.uniform(k3, (3 * hidden_size,), jnp.float32, -bound, bound)
        b_hh = jax.random.uniform(k4, (3 * hidden_size,), jnp.float32, -bound, bound)
        params.append((w_ih, w_hh, b_ih, b_hh))
    return params


def _pack_matrix(w, n_rows, H, dtype):
    """PyTorch (3H, in) -> (n_rows, 3*GATE_PAD): transposed, gate columns at 128-lane
    blocks [r|z|n], rows beyond `in` zero."""
    wt = jnp.asarray(w, jnp.float32).T                 # (in, 3H)
    in_features = wt.shape[0]
    G = GATE_PAD
    out = jnp.zeros((n_rows, 3 * G), jnp.float32)
    for g in range(3):
        out = out.at[:in_features, g * G:g * G + H].set(wt[:, g * H:(g + 1) * H])
    return out.astype(dtype)


def _pack_bias(b_ih, b_hh, H):
    """Combined bias [b_ir+b_hr | b_iz+b_hz | b_in] gate-padded to (1, 3G); b_hn (1, G)."""
    G = GATE_PAD
    bi = jnp.zeros((1, 3 * G), jnp.float32)
    bi = bi.at[0, 0:H].set(b_ih[0:H] + b_hh[0:H])
    bi = bi.at[0, G:G + H].set(b_ih[H:2 * H] + b_hh[H:2 * H])
    bi = bi.at[0, 2 * G:2 * G + H].set(b_ih[2 * H:3 * H])
    bhn = jnp.zeros((1, G), jnp.float32).at[0, :H].set(b_hh[2 * H:3 * H])
    return bi, bhn


def prepare_gru_params(params, input_size, hidden_size):
    """One-time weight/bias repacking (outside the forward path)."""
    prepared = []
    for layer, (w_ih, w_hh, b_ih, b_hh) in enumerate(params):
        # Layer 0 consumes the raw (B*T, In) input; deeper layers consume the
        # lane-padded (B, GATE_PAD) hidden state, so their W_ih gets padded rows.
        in_rows = input_size if layer == 0 else GATE_PAD
        wih_p = _pack_matrix(w_ih, in_rows, hidden_size, MXU_DTYPE)
        whh_p = _pack_matrix(w_hh, GATE_PAD, hidden_size, MXU_DTYPE)
        bi, bhn = _pack_bias(b_ih, b_hh, hidden_size)
        prepared.append((wih_p, whh_p, bi, bhn))
    return tuple(prepared)


@jax.jit
def gru_model_forward(prepared_params, x, h0):
    """Equivalent of GRUModel.forward: 2-layer GRU, returns `output` (B, T, H).
    Single XLA op: one fused pallas_call, no wrapper transposes/pads."""
    (wih0, whh0, bi0, bhn0), (wih1, whh1, bi1, bhn1) = prepared_params
    B, T, _ = x.shape
    H = h0.shape[-1]

    vmem = pl.BlockSpec(memory_space=pltpu.MemorySpace.VMEM)
    return pl.pallas_call(
        gru2_kernel,
        out_shape=jax.ShapeDtypeStruct((B, T, H), jnp.float32),
        in_specs=[vmem] * 10,
        out_specs=vmem,
    )(x, h0, wih0, whh0, bi0, bhn0, wih1, whh1, bi1, bhn1)


def gru_reference(params, x, h0, weight_dtype=jnp.float32):
    """Pure-JAX reference GRU (PyTorch semantics). `weight_dtype` lets us round the
    weights through bf16 to mirror the kernel's MXU-operand precision."""
    B, T, _ = x.shape
    H = h0.shape[-1]
    seq = x
    for layer in range(len(params)):
        w_ih, w_hh, b_ih, b_hh = params[layer]
        w_ih = w_ih.astype(weight_dtype).astype(jnp.float32)
        w_hh = w_hh.astype(weight_dtype).astype(jnp.float32)
        h = h0[layer]
        outs = []
        for t in range(T):
            x_t = seq[:, t, :]
            gi = x_t @ w_ih.T + b_ih
            gh = h @ w_hh.T + b_hh
            r = jax.nn.sigmoid(gi[:, :H] + gh[:, :H])
            z = jax.nn.sigmoid(gi[:, H:2 * H] + gh[:, H:2 * H])
            n = jnp.tanh(gi[:, 2 * H:] + r * gh[:, 2 * H:])
            h = (1.0 - z) * n + z * h
            outs.append(h)
        seq = jnp.stack(outs, axis=1)
    return seq


if __name__ == "__main__":
    key = jax.random.PRNGKey(0)
    k_param, k_x, k_h = jax.random.split(key, 3)

    # GRUModel.__init__ hard-codes nn.GRU(20, 20, 2, batch_first=True)
    INPUT, HIDDEN, LAYERS = 20, 20, 2
    params = init_gru_params(k_param, INPUT, HIDDEN, LAYERS)
    prepared = prepare_gru_params(params, INPUT, HIDDEN)

    # forward() uses randn(5, 3, 20) input and randn(2, 5, 20) h0 -> deterministic here
    x = jax.random.normal(k_x, (5, 3, 20), dtype=jnp.float32)    # (batch=5, seq=3, feat=20)
    h0 = jax.random.normal(k_h, (2, 5, 20), dtype=jnp.float32)   # (layers=2, batch=5, hidden=20)

    out = gru_model_forward(prepared, x, h0)
    out = jax.block_until_ready(out)
    assert out.shape == (5, 3, 20), out.shape

    # Reference uses the same bf16-rounded weights as the kernel's MXU operands, so the
    # only remaining differences are bf16 activation casts at matmul inputs (~1e-3).
    ref = gru_reference(params, x, h0, weight_dtype=MXU_DTYPE)
    assert jnp.allclose(out, ref, rtol=2e-2, atol=2e-2), "mismatch vs pure-JAX reference"

    print("KERNEL_OK")
</pallas_src>

<mosaic_0001>
module attributes {stable_mosaic.version = 11 : i64} {
  func.func @gru2_kernel(%arg0: memref<5x3x20xf32, #tpu.memory_space<vmem>>, %arg1: memref<2x5x20xf32, #tpu.memory_space<vmem>>, %arg2: memref<20x384xbf16, #tpu.memory_space<vmem>>, %arg3: memref<128x384xbf16, #tpu.memory_space<vmem>>, %arg4: memref<1x384xf32, #tpu.memory_space<vmem>>, %arg5: memref<1x128xf32, #tpu.memory_space<vmem>>, %arg6: memref<128x384xbf16, #tpu.memory_space<vmem>>, %arg7: memref<128x384xbf16, #tpu.memory_space<vmem>>, %arg8: memref<1x384xf32, #tpu.memory_space<vmem>>, %arg9: memref<1x128xf32, #tpu.memory_space<vmem>>, %arg10: memref<5x3x20xf32, #tpu.memory_space<vmem>>) attributes {dimension_semantics = [], scalar_prefetch = 0 : i64, scratch_operands = 0 : i64, tpu.core_type = #tpu.core_type<tc>} {
    %c0 = arith.constant 0 : index
    %c0_0 = arith.constant 0 : index
    %c0_1 = arith.constant 0 : index
    %0 = vector.load %arg0[%c0, %c0_0, %c0_1] : memref<5x3x20xf32, #tpu.memory_space<vmem>>, vector<1x3x20xf32>
    %1 = vector.shape_cast %0 : vector<1x3x20xf32> to vector<3x20xf32>
    %c1 = arith.constant 1 : index
    %c0_2 = arith.constant 0 : index
    %c0_3 = arith.constant 0 : index
    %2 = vector.load %arg0[%c1, %c0_2, %c0_3] : memref<5x3x20xf32, #tpu.memory_space<vmem>>, vector<1x3x20xf32>
    %3 = vector.shape_cast %2 : vector<1x3x20xf32> to vector<3x20xf32>
    %c2 = arith.constant 2 : index
    %c0_4 = arith.constant 0 : index
    %c0_5 = arith.constant 0 : index
    %4 = vector.load %arg0[%c2, %c0_4, %c0_5] : memref<5x3x20xf32, #tpu.memory_space<vmem>>, vector<1x3x20xf32>
    %5 = vector.shape_cast %4 : vector<1x3x20xf32> to vector<3x20xf32>
    %c3 = arith.constant 3 : index
    %c0_6 = arith.constant 0 : index
    %c0_7 = arith.constant 0 : index
    %6 = vector.load %arg0[%c3, %c0_6, %c0_7] : memref<5x3x20xf32, #tpu.memory_space<vmem>>, vector<1x3x20xf32>
    %7 = vector.shape_cast %6 : vector<1x3x20xf32> to vector<3x20xf32>
    %c4 = arith.constant 4 : index
    %c0_8 = arith.constant 0 : index
    %c0_9 = arith.constant 0 : index
    %8 = vector.load %arg0[%c4, %c0_8, %c0_9] : memref<5x3x20xf32, #tpu.memory_space<vmem>>, vector<1x3x20xf32>
    %9 = vector.shape_cast %8 : vector<1x3x20xf32> to vector<3x20xf32>
    %10 = vector.extract_strided_slice %1 {offsets = [0, 0], sizes = [1, 20], strides = [1, 1]} : vector<3x20xf32> to vector<1x20xf32>
    %11 = vector.extract_strided_slice %3 {offsets = [0, 0], sizes = [1, 20], strides = [1, 1]} : vector<3x20xf32> to vector<1x20xf32>
    %12 = vector.extract_strided_slice %5 {offsets = [0, 0], sizes = [1, 20], strides = [1, 1]} : vector<3x20xf32> to vector<1x20xf32>
    %13 = vector.extract_strided_slice %7 {offsets = [0, 0], sizes = [1, 20], strides = [1, 1]} : vector<3x20xf32> to vector<1x20xf32>
    %14 = vector.extract_strided_slice %9 {offsets = [0, 0], sizes = [1, 20], strides = [1, 1]} : vector<3x20xf32> to vector<1x20xf32>
    %15 = vector.extract_strided_slice %1 {offsets = [1, 0], sizes = [1, 20], strides = [1, 1]} : vector<3x20xf32> to vector<1x20xf32>
    %16 = vector.extract_strided_slice %3 {offsets = [1, 0], sizes = [1, 20], strides = [1, 1]} : vector<3x20xf32> to vector<1x20xf32>
    %17 = vector.extract_strided_slice %5 {offsets = [1, 0], sizes = [1, 20], strides = [1, 1]} : vector<3x20xf32> to vector<1x20xf32>
    %18 = vector.extract_strided_slice %7 {offsets = [1, 0], sizes = [1, 20], strides = [1, 1]} : vector<3x20xf32> to vector<1x20xf32>
    %19 = vector.extract_strided_slice %9 {offsets = [1, 0], sizes = [1, 20], strides = [1, 1]} : vector<3x20xf32> to vector<1x20xf32>
    %20 = vector.extract_strided_slice %1 {offsets = [2, 0], sizes = [1, 20], strides = [1, 1]} : vector<3x20xf32> to vector<1x20xf32>
    %21 = vector.extract_strided_slice %3 {offsets = [2, 0], sizes = [1, 20], strides = [1, 1]} : vector<3x20xf32> to vector<1x20xf32>
    %22 = vector.extract_strided_slice %5 {offsets = [2, 0], sizes = [1, 20], strides = [1, 1]} : vector<3x20xf32> to vector<1x20xf32>
    %23 = vector.extract_strided_slice %7 {offsets = [2, 0], sizes = [1, 20], strides = [1, 1]} : vector<3x20xf32> to vector<1x20xf32>
    %24 = vector.extract_strided_slice %9 {offsets = [2, 0], sizes = [1, 20], strides = [1, 1]} : vector<3x20xf32> to vector<1x20xf32>
    %25 = tpu.concatenate %10, %11, %12, %13, %14, %15, %16, %17, %18, %19, %20, %21, %22, %23, %24 in 0 : vector<1x20xf32>, vector<1x20xf32>, vector<1x20xf32>, vector<1x20xf32>, vector<1x20xf32>, vector<1x20xf32>, vector<1x20xf32>, vector<1x20xf32>, vector<1x20xf32>, vector<1x20xf32>, vector<1x20xf32>, vector<1x20xf32>, vector<1x20xf32>, vector<1x20xf32>, vector<1x20xf32> -> vector<15x20xf32>
    %26 = arith.truncf %25 : vector<15x20xf32> to vector<15x20xbf16>
    %c0_10 = arith.constant 0 : index
    %c0_11 = arith.constant 0 : index
    %27 = vector.load %arg2[%c0_10, %c0_11] : memref<20x384xbf16, #tpu.memory_space<vmem>>, vector<20x384xbf16>
    %cst = arith.constant dense<0.000000e+00> : vector<15x384xf32>
    %28 = tpu.matmul %26, %27, %cst {dimension_numbers = #tpu.dot_dimension_numbers<[1], [0], [0], [1], [0, 0, 1, 1], [], []>} : vector<15x20xbf16>, vector<20x384xbf16>, vector<15x384xf32> -> vector<15x384xf32>
    %c0_12 = arith.constant 0 : index
    %c0_13 = arith.constant 0 : index
    %29 = vector.load %arg4[%c0_12, %c0_13] : memref<1x384xf32, #tpu.memory_space<vmem>>, vector<1x384xf32>
    %30 = vector.broadcast %29 : vector<1x384xf32> to vector<15x384xf32>
    %31 = arith.addf %28, %30 : vector<15x384xf32>
    %cst_14 = arith.constant 0.000000e+00 : f32
    %32 = vector.broadcast %cst_14 : f32 to vector<5x108xf32>
    %c0_15 = arith.constant 0 : index
    %c0_16 = arith.constant 0 : index
    %c0_17 = arith.constant 0 : index
    %33 = vector.load %arg1[%c0_15, %c0_16, %c0_17] : memref<2x5x20xf32, #tpu.memory_space<vmem>>, vector<1x5x20xf32>
    %34 = vector.shape_cast %33 : vector<1x5x20xf32> to vector<5x20xf32>
    %35 = tpu.concatenate %34, %32 in 1 : vector<5x20xf32>, vector<5x108xf32> -> vector<5x128xf32>
    %c0_18 = arith.constant 0 : index
    %c0_19 = arith.constant 0 : index
    %36 = vector.load %arg3[%c0_18, %c0_19] : memref<128x384xbf16, #tpu.memory_space<vmem>>, vector<128x384xbf16>
    %c0_20 = arith.constant 0 : index
    %c0_21 = arith.constant 0 : index
    %37 = vector.load %arg5[%c0_20, %c0_21] : memref<1x128xf32, #tpu.memory_space<vmem>>, vector<1x128xf32>
    %38 = vector.shape_cast %37 : vector<1x128xf32> to vector<1x128xf32>
    %39 = vector.broadcast %38 : vector<1x128xf32> to vector<5x128xf32>
    %40 = vector.extract_strided_slice %31 {offsets = [0, 0], sizes = [5, 384], strides = [1, 1]} : vector<15x384xf32> to vector<5x384xf32>
    %41 = vector.extract_strided_slice %31 {offsets = [5, 0], sizes = [5, 384], strides = [1, 1]} : vector<15x384xf32> to vector<5x384xf32>
    %42 = vector.extract_strided_slice %31 {offsets = [10, 0], sizes = [5, 384], strides = [1, 1]} : vector<15x384xf32> to vector<5x384xf32>
    %43 = arith.truncf %35 : vector<5x128xf32> to vector<5x128xbf16>
    %cst_22 = arith.constant dense<0.000000e+00> : vector<5x384xf32>
    %44 = tpu.matmul %43, %36, %cst_22 {dimension_numbers = #tpu.dot_dimension_numbers<[1], [0], [0], [1], [0, 0, 1, 1], [], []>} : vector<5x128xbf16>, vector<128x384xbf16>, vector<5x384xf32> -> vector<5x384xf32>
    %45 = vector.extract_strided_slice %40 {offsets = [0, 0], sizes = [5, 128], strides = [1, 1]} : vector<5x384xf32> to vector<5x128xf32>
    %46 = vector.extract_strided_slice %44 {offsets = [0, 0], sizes = [5, 128], strides = [1, 1]} : vector<5x384xf32> to vector<5x128xf32>
    %47 = arith.addf %45, %46 : vector<5x128xf32>
    %cst_23 = arith.constant 5.000000e-01 : f32
    %48 = vector.broadcast %cst_23 : f32 to vector<5x128xf32>
    %49 = arith.mulf %48, %47 : vector<5x128xf32>
    %50 = math.tanh %49 : vector<5x128xf32>
    %cst_24 = arith.constant 5.000000e-01 : f32
    %51 = vector.broadcast %cst_24 : f32 to vector<5x128xf32>
    %52 = arith.mulf %51, %50 : vector<5x128xf32>
    %cst_25 = arith.constant 5.000000e-01 : f32
    %53 = vector.broadcast %cst_25 : f32 to vector<5x128xf32>
    %54 = arith.addf %52, %53 : vector<5x128xf32>
    %55 = vector.extract_strided_slice %40 {offsets = [0, 128], sizes = [5, 128], strides = [1, 1]} : vector<5x384xf32> to vector<5x128xf32>
    %56 = vector.extract_strided_slice %44 {offsets = [0, 128], sizes = [5, 128], strides = [1, 1]} : vector<5x384xf32> to vector<5x128xf32>
    %57 = arith.addf %55, %56 : vector<5x128xf32>
    %cst_26 = arith.constant 5.000000e-01 : f32
    %58 = vector.broadcast %cst_26 : f32 to vector<5x128xf32>
    %59 = arith.mulf %58, %57 : vector<5x128xf32>
    %60 = math.tanh %59 : vector<5x128xf32>
    %cst_27 = arith.constant 5.000000e-01 : f32
    %61 = vector.broadcast %cst_27 : f32 to vector<5x128xf32>
    %62 = arith.mulf %61, %60 : vector<5x128xf32>
    %cst_28 = arith.constant 5.000000e-01 : f32
    %63 = vector.broadcast %cst_28 : f32 to vector<5x128xf32>
    %64 = arith.addf %62, %63 : vector<5x128xf32>
    %65 = vector.extract_strided_slice %40 {offsets = [0, 256], sizes = [5, 128], strides = [1, 1]} : vector<5x384xf32> to vector<5x128xf32>
    %66 = vector.extract_strided_slice %44 {offsets = [0, 256], sizes = [5, 128], strides = [1, 1]} : vector<5x384xf32> to vector<5x128xf32>
    %67 = arith.addf %66, %39 : vector<5x128xf32>
    %68 = arith.mulf %54, %67 : vector<5x128xf32>
    %69 = arith.addf %65, %68 : vector<5x128xf32>
    %70 = math.tanh %69 : vector<5x128xf32>
    %cst_29 = arith.constant 1.000000e+00 : f32
    %71 = vector.broadcast %cst_29 : f32 to vector<5x128xf32>
    %72 = arith.subf %71, %64 : vector<5x128xf32>
    %73 = arith.mulf %72, %70 : vector<5x128xf32>
    %74 = arith.mulf %64, %35 : vector<5x128xf32>
    %75 = arith.addf %73, %74 : vector<5x128xf32>
    %76 = arith.truncf %75 : vector<5x128xf32> to vector<5x128xbf16>
    %cst_30 = arith.constant dense<0.000000e+00> : vector<5x384xf32>
    %77 = tpu.matmul %76, %36, %cst_30 {dimension_numbers = #tpu.dot_dimension_numbers<[1], [0], [0], [1], [0, 0, 1, 1], [], []>} : vector<5x128xbf16>, vector<128x384xbf16>, vector<5x384xf32> -> vector<5x384xf32>
    %78 = vector.extract_strided_slice %41 {offsets = [0, 0], sizes = [5, 128], strides = [1, 1]} : vector<5x384xf32> to vector<5x128xf32>
    %79 = vector.extract_strided_slice %77 {offsets = [0, 0], sizes = [5, 128], strides = [1, 1]} : vector<5x384xf32> to vector<5x128xf32>
    %80 = arith.addf %78, %79 : vector<5x128xf32>
    %cst_31 = arith.constant 5.000000e-01 : f32
    %81 = vector.broadcast %cst_31 : f32 to vector<5x128xf32>
    %82 = arith.mulf %81, %80 : vector<5x128xf32>
    %83 = math.tanh %82 : vector<5x128xf32>
    %cst_32 = arith.constant 5.000000e-01 : f32
    %84 = vector.broadcast %cst_32 : f32 to vector<5x128xf32>
    %85 = arith.mulf %84, %83 : vector<5x128xf32>
    %cst_33 = arith.constant 5.000000e-01 : f32
    %86 = vector.broadcast %cst_33 : f32 to vector<5x128xf32>
    %87 = arith.addf %85, %86 : vector<5x128xf32>
    %88 = vector.extract_strided_slice %41 {offsets = [0, 128], sizes = [5, 128], strides = [1, 1]} : vector<5x384xf32> to vector<5x128xf32>
    %89 = vector.extract_strided_slice %77 {offsets = [0, 128], sizes = [5, 128], strides = [1, 1]} : vector<5x384xf32> to vector<5x128xf32>
    %90 = arith.addf %88, %89 : vector<5x128xf32>
    %cst_34 = arith.constant 5.000000e-01 : f32
    %91 = vector.broadcast %cst_34 : f32 to vector<5x128xf32>
    %92 = arith.mulf %91, %90 : vector<5x128xf32>
    %93 = math.tanh %92 : vector<5x128xf32>
    %cst_35 = arith.constant 5.000000e-01 : f32
    %94 = vector.broadcast %cst_35 : f32 to vector<5x128xf32>
    %95 = arith.mulf %94, %93 : vector<5x128xf32>
    %cst_36 = arith.constant 5.000000e-01 : f32
    %96 = vector.broadcast %cst_36 : f32 to vector<5x128xf32>
    %97 = arith.addf %95, %96 : vector<5x128xf32>
    %98 = vector.extract_strided_slice %41 {offsets = [0, 256], sizes = [5, 128], strides = [1, 1]} : vector<5x384xf32> to vector<5x128xf32>
    %99 = vector.extract_strided_slice %77 {offsets = [0, 256], sizes = [5, 128], strides = [1, 1]} : vector<5x384xf32> to vector<5x128xf32>
    %100 = arith.addf %99, %39 : vector<5x128xf32>
    %101 = arith.mulf %87, %100 : vector<5x128xf32>
    %102 = arith.addf %98, %101 : vector<5x128xf32>
    %103 = math.tanh %102 : vector<5x128xf32>
    %cst_37 = arith.constant 1.000000e+00 : f32
    %104 = vector.broadcast %cst_37 : f32 to vector<5x128xf32>
    %105 = arith.subf %104, %97 : vector<5x128xf32>
    %106 = arith.mulf %105, %103 : vector<5x128xf32>
    %107 = arith.mulf %97, %75 : vector<5x128xf32>
    %108 = arith.addf %106, %107 : vector<5x128xf32>
    %109 = arith.truncf %108 : vector<5x128xf32> to vector<5x128xbf16>
    %cst_38 = arith.constant dense<0.000000e+00> : vector<5x384xf32>
    %110 = tpu.matmul %109, %36, %cst_38 {dimension_numbers = #tpu.dot_dimension_numbers<[1], [0], [0], [1], [0, 0, 1, 1], [], []>} : vector<5x128xbf16>, vector<128x384xbf16>, vector<5x384xf32> -> vector<5x384xf32>
    %111 = vector.extract_strided_slice %42 {offsets = [0, 0], sizes = [5, 128], strides = [1, 1]} : vector<5x384xf32> to vector<5x128xf32>
    %112 = vector.extract_strided_slice %110 {offsets = [0, 0], sizes = [5, 128], strides = [1, 1]} : vector<5x384xf32> to vector<5x128xf32>
    %113 = arith.addf %111, %112 : vector<5x128xf32>
    %cst_39 = arith.constant 5.000000e-01 : f32
    %114 = vector.broadcast %cst_39 : f32 to vector<5x128xf32>
    %115 = arith.mulf %114, %113 : vector<5x128xf32>
    %116 = math.tanh %115 : vector<5x128xf32>
    %cst_40 = arith.constant 5.000000e-01 : f32
    %117 = vector.broadcast %cst_40 : f32 to vector<5x128xf32>
    %118 = arith.mulf %117, %116 : vector<5x128xf32>
    %cst_41 = arith.constant 5.000000e-01 : f32
    %119 = vector.broadcast %cst_41 : f32 to vector<5x128xf32>
    %120 = arith.addf %118, %119 : vector<5x128xf32>
    %121 = vector.extract_strided_slice %42 {offsets = [0, 128], sizes = [5, 128], strides = [1, 1]} : vector<5x384xf32> to vector<5x128xf32>
    %122 = vector.extract_strided_slice %110 {offsets = [0, 128], sizes = [5, 128], strides = [1, 1]} : vector<5x384xf32> to vector<5x128xf32>
    %123 = arith.addf %121, %122 : vector<5x128xf32>
    %cst_42 = arith.constant 5.000000e-01 : f32
    %124 = vector.broadcast %cst_42 : f32 to vector<5x128xf32>
    %125 = arith.mulf %124, %123 : vector<5x128xf32>
    %126 = math.tanh %125 : vector<5x128xf32>
    %cst_43 = arith.constant 5.000000e-01 : f32
    %127 = vector.broadcast %cst_43 : f32 to vector<5x128xf32>
    %128 = arith.mulf %127, %126 : vector<5x128xf32>
    %cst_44 = arith.constant 5.000000e-01 : f32
    %129 = vector.broadcast %cst_44 : f32 to vector<5x128xf32>
    %130 = arith.addf %128, %129 : vector<5x128xf32>
    %131 = vector.extract_strided_slice %42 {offsets = [0, 256], sizes = [5, 128], strides = [1, 1]} : vector<5x384xf32> to vector<5x128xf32>
    %132 = vector.extract_strided_slice %110 {offsets = [0, 256], sizes = [5, 128], strides = [1, 1]} : vector<5x384xf32> to vector<5x128xf32>
    %133 = arith.addf %132, %39 : vector<5x128xf32>
    %134 = arith.mulf %120, %133 : vector<5x128xf32>
    %135 = arith.addf %131, %134 : vector<5x128xf32>
    %136 = math.tanh %135 : vector<5x128xf32>
    %cst_45 = arith.constant 1.000000e+00 : f32
    %137 = vector.broadcast %cst_45 : f32 to vector<5x128xf32>
    %138 = arith.subf %137, %130 : vector<5x128xf32>
    %139 = arith.mulf %138, %136 : vector<5x128xf32>
    %140 = arith.mulf %130, %108 : vector<5x128xf32>
    %141 = arith.addf %139, %140 : vector<5x128xf32>
    %142 = tpu.concatenate %75, %108, %141 in 0 : vector<5x128xf32>, vector<5x128xf32>, vector<5x128xf32> -> vector<15x128xf32>
    %143 = arith.truncf %142 : vector<15x128xf32> to vector<15x128xbf16>
    %c0_46 = arith.constant 0 : index
    %c0_47 = arith.constant 0 : index
    %144 = vector.load %arg6[%c0_46, %c0_47] : memref<128x384xbf16, #tpu.memory_space<vmem>>, vector<128x384xbf16>
    %cst_48 = arith.constant dense<0.000000e+00> : vector<15x384xf32>
    %145 = tpu.matmul %143, %144, %cst_48 {dimension_numbers = #tpu.dot_dimension_numbers<[1], [0], [0], [1], [0, 0, 1, 1], [], []>} : vector<15x128xbf16>, vector<128x384xbf16>, vector<15x384xf32> -> vector<15x384xf32>
    %c0_49 = arith.constant 0 : index
    %c0_50 = arith.constant 0 : index
    %146 = vector.load %arg8[%c0_49, %c0_50] : memref<1x384xf32, #tpu.memory_space<vmem>>, vector<1x384xf32>
    %147 = vector.broadcast %146 : vector<1x384xf32> to vector<15x384xf32>
    %148 = arith.addf %145, %147 : vector<15x384xf32>
    %c1_51 = arith.constant 1 : index
    %c0_52 = arith.constant 0 : index
    %c0_53 = arith.constant 0 : index
    %149 = vector.load %arg1[%c1_51, %c0_52, %c0_53] : memref<2x5x20xf32, #tpu.memory_space<vmem>>, vector<1x5x20xf32>
    %150 = vector.shape_cast %149 : vector<1x5x20xf32> to vector<5x20xf32>
    %151 = tpu.concatenate %150, %32 in 1 : vector<5x20xf32>, vector<5x108xf32> -> vector<5x128xf32>
    %c0_54 = arith.constant 0 : index
    %c0_55 = arith.constant 0 : index
    %152 = vector.load %arg7[%c0_54, %c0_55] : memref<128x384xbf16, #tpu.memory_space<vmem>>, vector<128x384xbf16>
    %c0_56 = arith.constant 0 : index
    %c0_57 = arith.constant 0 : index
    %153 = vector.load %arg9[%c0_56, %c0_57] : memref<1x128xf32, #tpu.memory_space<vmem>>, vector<1x128xf32>
    %154 = vector.shape_cast %153 : vector<1x128xf32> to vector<1x128xf32>
    %155 = vector.broadcast %154 : vector<1x128xf32> to vector<5x128xf32>
    %156 = vector.extract_strided_slice %148 {offsets = [0, 0], sizes = [5, 384], strides = [1, 1]} : vector<15x384xf32> to vector<5x384xf32>
    %157 = vector.extract_strided_slice %148 {offsets = [5, 0], sizes = [5, 384], strides = [1, 1]} : vector<15x384xf32> to vector<5x384xf32>
    %158 = vector.extract_strided_slice %148 {offsets = [10, 0], sizes = [5, 384], strides = [1, 1]} : vector<15x384xf32> to vector<5x384xf32>
    %159 = arith.truncf %151 : vector<5x128xf32> to vector<5x128xbf16>
    %cst_58 = arith.constant dense<0.000000e+00> : vector<5x384xf32>
    %160 = tpu.matmul %159, %152, %cst_58 {dimension_numbers = #tpu.dot_dimension_numbers<[1], [0], [0], [1], [0, 0, 1, 1], [], []>} : vector<5x128xbf16>, vector<128x384xbf16>, vector<5x384xf32> -> vector<5x384xf32>
    %161 = vector.extract_strided_slice %156 {offsets = [0, 0], sizes = [5, 128], strides = [1, 1]} : vector<5x384xf32> to vector<5x128xf32>
    %162 = vector.extract_strided_slice %160 {offsets = [0, 0], sizes = [5, 128], strides = [1, 1]} : vector<5x384xf32> to vector<5x128xf32>
    %163 = arith.addf %161, %162 : vector<5x128xf32>
    %cst_59 = arith.constant 5.000000e-01 : f32
    %164 = vector.broadcast %cst_59 : f32 to vector<5x128xf32>
    %165 = arith.mulf %164, %163 : vector<5x128xf32>
    %166 = math.tanh %165 : vector<5x128xf32>
    %cst_60 = arith.constant 5.000000e-01 : f32
    %167 = vector.broadcast %cst_60 : f32 to vector<5x128xf32>
    %168 = arith.mulf %167, %166 : vector<5x128xf32>
    %cst_61 = arith.constant 5.000000e-01 : f32
    %169 = vector.broadcast %cst_61 : f32 to vector<5x128xf32>
    %170 = arith.addf %168, %169 : vector<5x128xf32>
    %171 = vector.extract_strided_slice %156 {offsets = [0, 128], sizes = [5, 128], strides = [1, 1]} : vector<5x384xf32> to vector<5x128xf32>
    %172 = vector.extract_strided_slice %160 {offsets = [0, 128], sizes = [5, 128], strides = [1, 1]} : vector<5x384xf32> to vector<5x128xf32>
    %173 = arith.addf %171, %172 : vector<5x128xf32>
    %cst_62 = arith.constant 5.000000e-01 : f32
    %174 = vector.broadcast %cst_62 : f32 to vector<5x128xf32>
    %175 = arith.mulf %174, %173 : vector<5x128xf32>
    %176 = math.tanh %175 : vector<5x128xf32>
    %cst_63 = arith.constant 5.000000e-01 : f32
    %177 = vector.broadcast %cst_63 : f32 to vector<5x128xf32>
    %178 = arith.mulf %177, %176 : vector<5x128xf32>
    %cst_64 = arith.constant 5.000000e-01 : f32
    %179 = vector.broadcast %cst_64 : f32 to vector<5x128xf32>
    %180 = arith.addf %178, %179 : vector<5x128xf32>
    %181 = vector.extract_strided_slice %156 {offsets = [0, 256], sizes = [5, 128], strides = [1, 1]} : vector<5x384xf32> to vector<5x128xf32>
    %182 = vector.extract_strided_slice %160 {offsets = [0, 256], sizes = [5, 128], strides = [1, 1]} : vector<5x384xf32> to vector<5x128xf32>
    %183 = arith.addf %182, %155 : vector<5x128xf32>
    %184 = arith.mulf %170, %183 : vector<5x128xf32>
    %185 = arith.addf %181, %184 : vector<5x128xf32>
    %186 = math.tanh %185 : vector<5x128xf32>
    %cst_65 = arith.constant 1.000000e+00 : f32
    %187 = vector.broadcast %cst_65 : f32 to vector<5x128xf32>
    %188 = arith.subf %187, %180 : vector<5x128xf32>
    %189 = arith.mulf %188, %186 : vector<5x128xf32>
    %190 = arith.mulf %180, %151 : vector<5x128xf32>
    %191 = arith.addf %189, %190 : vector<5x128xf32>
    %192 = arith.truncf %191 : vector<5x128xf32> to vector<5x128xbf16>
    %cst_66 = arith.constant dense<0.000000e+00> : vector<5x384xf32>
    %193 = tpu.matmul %192, %152, %cst_66 {dimension_numbers = #tpu.dot_dimension_numbers<[1], [0], [0], [1], [0, 0, 1, 1], [], []>} : vector<5x128xbf16>, vector<128x384xbf16>, vector<5x384xf32> -> vector<5x384xf32>
    %194 = vector.extract_strided_slice %157 {offsets = [0, 0], sizes = [5, 128], strides = [1, 1]} : vector<5x384xf32> to vector<5x128xf32>
    %195 = vector.extract_strided_slice %193 {offsets = [0, 0], sizes = [5, 128], strides = [1, 1]} : vector<5x384xf32> to vector<5x128xf32>
    %196 = arith.addf %194, %195 : vector<5x128xf32>
    %cst_67 = arith.constant 5.000000e-01 : f32
    %197 = vector.broadcast %cst_67 : f32 to vector<5x128xf32>
    %198 = arith.mulf %197, %196 : vector<5x128xf32>
    %199 = math.tanh %198 : vector<5x128xf32>
    %cst_68 = arith.constant 5.000000e-01 : f32
    %200 = vector.broadcast %cst_68 : f32 to vector<5x128xf32>
    %201 = arith.mulf %200, %199 : vector<5x128xf32>
    %cst_69 = arith.constant 5.000000e-01 : f32
    %202 = vector.broadcast %cst_69 : f32 to vector<5x128xf32>
    %203 = arith.addf %201, %202 : vector<5x128xf32>
    %204 = vector.extract_strided_slice %157 {offsets = [0, 128], sizes = [5, 128], strides = [1, 1]} : vector<5x384xf32> to vector<5x128xf32>
    %205 = vector.extract_strided_slice %193 {offsets = [0, 128], sizes = [5, 128], strides = [1, 1]} : vector<5x384xf32> to vector<5x128xf32>
    %206 = arith.addf %204, %205 : vector<5x128xf32>
    %cst_70 = arith.constant 5.000000e-01 : f32
    %207 = vector.broadcast %cst_70 : f32 to vector<5x128xf32>
    %208 = arith.mulf %207, %206 : vector<5x128xf32>
    %209 = math.tanh %208 : vector<5x128xf32>
    %cst_71 = arith.constant 5.000000e-01 : f32
    %210 = vector.broadcast %cst_71 : f32 to vector<5x128xf32>
    %211 = arith.mulf %210, %209 : vector<5x128xf32>
    %cst_72 = arith.constant 5.000000e-01 : f32
    %212 = vector.broadcast %cst_72 : f32 to vector<5x128xf32>
    %213 = arith.addf %211, %212 : vector<5x128xf32>
    %214 = vector.extract_strided_slice %157 {offsets = [0, 256], sizes = [5, 128], strides = [1, 1]} : vector<5x384xf32> to vector<5x128xf32>
    %215 = vector.extract_strided_slice %193 {offsets = [0, 256], sizes = [5, 128], strides = [1, 1]} : vector<5x384xf32> to vector<5x128xf32>
    %216 = arith.addf %215, %155 : vector<5x128xf32>
    %217 = arith.mulf %203, %216 : vector<5x128xf32>
    %218 = arith.addf %214, %217 : vector<5x128xf32>
    %219 = math.tanh %218 : vector<5x128xf32>
    %cst_73 = arith.constant 1.000000e+00 : f32
    %220 = vector.broadcast %cst_73 : f32 to vector<5x128xf32>
    %221 = arith.subf %220, %213 : vector<5x128xf32>
    %222 = arith.mulf %221, %219 : vector<5x128xf32>
    %223 = arith.mulf %213, %191 : vector<5x128xf32>
    %224 = arith.addf %222, %223 : vector<5x128xf32>
    %225 = arith.truncf %224 : vector<5x128xf32> to vector<5x128xbf16>
    %cst_74 = arith.constant dense<0.000000e+00> : vector<5x384xf32>
    %226 = tpu.matmul %225, %152, %cst_74 {dimension_numbers = #tpu.dot_dimension_numbers<[1], [0], [0], [1], [0, 0, 1, 1], [], []>} : vector<5x128xbf16>, vector<128x384xbf16>, vector<5x384xf32> -> vector<5x384xf32>
    %227 = vector.extract_strided_slice %158 {offsets = [0, 0], sizes = [5, 128], strides = [1, 1]} : vector<5x384xf32> to vector<5x128xf32>
    %228 = vector.extract_strided_slice %226 {offsets = [0, 0], sizes = [5, 128], strides = [1, 1]} : vector<5x384xf32> to vector<5x128xf32>
    %229 = arith.addf %227, %228 : vector<5x128xf32>
    %cst_75 = arith.constant 5.000000e-01 : f32
    %230 = vector.broadcast %cst_75 : f32 to vector<5x128xf32>
    %231 = arith.mulf %230, %229 : vector<5x128xf32>
    %232 = math.tanh %231 : vector<5x128xf32>
    %cst_76 = arith.constant 5.000000e-01 : f32
    %233 = vector.broadcast %cst_76 : f32 to vector<5x128xf32>
    %234 = arith.mulf %233, %232 : vector<5x128xf32>
    %cst_77 = arith.constant 5.000000e-01 : f32
    %235 = vector.broadcast %cst_77 : f32 to vector<5x128xf32>
    %236 = arith.addf %234, %235 : vector<5x128xf32>
    %237 = vector.extract_strided_slice %158 {offsets = [0, 128], sizes = [5, 128], strides = [1, 1]} : vector<5x384xf32> to vector<5x128xf32>
    %238 = vector.extract_strided_slice %226 {offsets = [0, 128], sizes = [5, 128], strides = [1, 1]} : vector<5x384xf32> to vector<5x128xf32>
    %239 = arith.addf %237, %238 : vector<5x128xf32>
    %cst_78 = arith.constant 5.000000e-01 : f32
    %240 = vector.broadcast %cst_78 : f32 to vector<5x128xf32>
    %241 = arith.mulf %240, %239 : vector<5x128xf32>
    %242 = math.tanh %241 : vector<5x128xf32>
    %cst_79 = arith.constant 5.000000e-01 : f32
    %243 = vector.broadcast %cst_79 : f32 to vector<5x128xf32>
    %244 = arith.mulf %243, %242 : vector<5x128xf32>
    %cst_80 = arith.constant 5.000000e-01 : f32
    %245 = vector.broadcast %cst_80 : f32 to vector<5x128xf32>
    %246 = arith.addf %244, %245 : vector<5x128xf32>
    %247 = vector.extract_strided_slice %158 {offsets = [0, 256], sizes = [5, 128], strides = [1, 1]} : vector<5x384xf32> to vector<5x128xf32>
    %248 = vector.extract_strided_slice %226 {offsets = [0, 256], sizes = [5, 128], strides = [1, 1]} : vector<5x384xf32> to vector<5x128xf32>
    %249 = arith.addf %248, %155 : vector<5x128xf32>
    %250 = arith.mulf %236, %249 : vector<5x128xf32>
    %251 = arith.addf %247, %250 : vector<5x128xf32>
    %252 = math.tanh %251 : vector<5x128xf32>
    %cst_81 = arith.constant 1.000000e+00 : f32
    %253 = vector.broadcast %cst_81 : f32 to vector<5x128xf32>
    %254 = arith.subf %253, %246 : vector<5x128xf32>
    %255 = arith.mulf %254, %252 : vector<5x128xf32>
    %256 = arith.mulf %246, %224 : vector<5x128xf32>
    %257 = arith.addf %255, %256 : vector<5x128xf32>
    %258 = vector.extract_strided_slice %191 {offsets = [0, 0], sizes = [1, 20], strides = [1, 1]} : vector<5x128xf32> to vector<1x20xf32>
    %259 = vector.extract_strided_slice %224 {offsets = [0, 0], sizes = [1, 20], strides = [1, 1]} : vector<5x128xf32> to vector<1x20xf32>
    %260 = vector.extract_strided_slice %257 {offsets = [0, 0], sizes = [1, 20], strides = [1, 1]} : vector<5x128xf32> to vector<1x20xf32>
    %261 = tpu.concatenate %258, %259, %260 in 0 : vector<1x20xf32>, vector<1x20xf32>, vector<1x20xf32> -> vector<3x20xf32>
    %c0_82 = arith.constant 0 : index
    %c0_83 = arith.constant 0 : index
    %c0_84 = arith.constant 0 : index
    %262 = vector.load %arg10[%c0_82, %c0_83, %c0_84] : memref<5x3x20xf32, #tpu.memory_space<vmem>>, vector<1x3x20xf32>
    %263 = vector.shape_cast %262 : vector<1x3x20xf32> to vector<3x20xf32>
    %264 = vector.shape_cast %261 : vector<3x20xf32> to vector<1x3x20xf32>
    tpu.vector_store %arg10[%c0_82, %c0_83, %c0_84], %264 {strides = array<i32>} : memref<5x3x20xf32, #tpu.memory_space<vmem>>, vector<1x3x20xf32>,
    %265 = vector.extract_strided_slice %191 {offsets = [1, 0], sizes = [1, 20], strides = [1, 1]} : vector<5x128xf32> to vector<1x20xf32>
    %266 = vector.extract_strided_slice %224 {offsets = [1, 0], sizes = [1, 20], strides = [1, 1]} : vector<5x128xf32> to vector<1x20xf32>
    %267 = vector.extract_strided_slice %257 {offsets = [1, 0], sizes = [1, 20], strides = [1, 1]} : vector<5x128xf32> to vector<1x20xf32>
    %268 = tpu.concatenate %265, %266, %267 in 0 : vector<1x20xf32>, vector<1x20xf32>, vector<1x20xf32> -> vector<3x20xf32>
    %c1_85 = arith.constant 1 : index
    %c0_86 = arith.constant 0 : index
    %c0_87 = arith.constant 0 : index
    %269 = vector.load %arg10[%c1_85, %c0_86, %c0_87] : memref<5x3x20xf32, #tpu.memory_space<vmem>>, vector<1x3x20xf32>
    %270 = vector.shape_cast %269 : vector<1x3x20xf32> to vector<3x20xf32>
    %271 = vector.shape_cast %268 : vector<3x20xf32> to vector<1x3x20xf32>
    tpu.vector_store %arg10[%c1_85, %c0_86, %c0_87], %271 {strides = array<i32>} : memref<5x3x20xf32, #tpu.memory_space<vmem>>, vector<1x3x20xf32>,
    %272 = vector.extract_strided_slice %191 {offsets = [2, 0], sizes = [1, 20], strides = [1, 1]} : vector<5x128xf32> to vector<1x20xf32>
    %273 = vector.extract_strided_slice %224 {offsets = [2, 0], sizes = [1, 20], strides = [1, 1]} : vector<5x128xf32> to vector<1x20xf32>
    %274 = vector.extract_strided_slice %257 {offsets = [2, 0], sizes = [1, 20], strides = [1, 1]} : vector<5x128xf32> to vector<1x20xf32>
    %275 = tpu.concatenate %272, %273, %274 in 0 : vector<1x20xf32>, vector<1x20xf32>, vector<1x20xf32> -> vector<3x20xf32>
    %c2_88 = arith.constant 2 : index
    %c0_89 = arith.constant 0 : index
    %c0_90 = arith.constant 0 : index
    %276 = vector.load %arg10[%c2_88, %c0_89, %c0_90] : memref<5x3x20xf32, #tpu.memory_space<vmem>>, vector<1x3x20xf32>
    %277 = vector.shape_cast %276 : vector<1x3x20xf32> to vector<3x20xf32>
    %278 = vector.shape_cast %275 : vector<3x20xf32> to vector<1x3x20xf32>
    tpu.vector_store %arg10[%c2_88, %c0_89, %c0_90], %278 {strides = array<i32>} : memref<5x3x20xf32, #tpu.memory_space<vmem>>, vector<1x3x20xf32>,
    %279 = vector.extract_strided_slice %191 {offsets = [3, 0], sizes = [1, 20], strides = [1, 1]} : vector<5x128xf32> to vector<1x20xf32>
    %280 = vector.extract_strided_slice %224 {offsets = [3, 0], sizes = [1, 20], strides = [1, 1]} : vector<5x128xf32> to vector<1x20xf32>
    %281 = vector.extract_strided_slice %257 {offsets = [3, 0], sizes = [1, 20], strides = [1, 1]} : vector<5x128xf32> to vector<1x20xf32>
    %282 = tpu.concatenate %279, %280, %281 in 0 : vector<1x20xf32>, vector<1x20xf32>, vector<1x20xf32> -> vector<3x20xf32>
    %c3_91 = arith.constant 3 : index
    %c0_92 = arith.constant 0 : index
    %c0_93 = arith.constant 0 : index
    %283 = vector.load %arg10[%c3_91, %c0_92, %c0_93] : memref<5x3x20xf32, #tpu.memory_space<vmem>>, vector<1x3x20xf32>
    %284 = vector.shape_cast %283 : vector<1x3x20xf32> to vector<3x20xf32>
    %285 = vector.shape_cast %282 : vector<3x20xf32> to vector<1x3x20xf32>
    tpu.vector_store %arg10[%c3_91, %c0_92, %c0_93], %285 {strides = array<i32>} : memref<5x3x20xf32, #tpu.memory_space<vmem>>, vector<1x3x20xf32>,
    %286 = vector.extract_strided_slice %191 {offsets = [4, 0], sizes = [1, 20], strides = [1, 1]} : vector<5x128xf32> to vector<1x20xf32>
    %287 = vector.extract_strided_slice %224 {offsets = [4, 0], sizes = [1, 20], strides = [1, 1]} : vector<5x128xf32> to vector<1x20xf32>
    %288 = vector.extract_strided_slice %257 {offsets = [4, 0], sizes = [1, 20], strides = [1, 1]} : vector<5x128xf32> to vector<1x20xf32>
    %289 = tpu.concatenate %286, %287, %288 in 0 : vector<1x20xf32>, vector<1x20xf32>, vector<1x20xf32> -> vector<3x20xf32>
    %c4_94 = arith.constant 4 : index
    %c0_95 = arith.constant 0 : index
    %c0_96 = arith.constant 0 : index
    %290 = vector.load %arg10[%c4_94, %c0_95, %c0_96] : memref<5x3x20xf32, #tpu.memory_space<vmem>>, vector<1x3x20xf32>
    %291 = vector.shape_cast %290 : vector<1x3x20xf32> to vector<3x20xf32>
    %292 = vector.shape_cast %289 : vector<3x20xf32> to vector<1x3x20xf32>
    tpu.vector_store %arg10[%c4_94, %c0_95, %c0_96], %292 {strides = array<i32>} : memref<5x3x20xf32, #tpu.memory_space<vmem>>, vector<1x3x20xf32>,
    return
  }
}

</mosaic_0001>

<bundles_post_ra>
// kernel: gru_model_forward.1
= control target key start
LH: loop header
LB: loop body
LE: loop exit
PB: predicated region body
PF: predicated region fallthrough
CT: control target
= control target key end

     0   :  { %15 = vsyncpa [#allocation3], 0  ;;  %s2933_s0 = inlined_call_operand.vmem [shape: f32[5,3,20], index: 0, kind: input, shape index: {}]   ;;  %s2934_s1 = inlined_call_operand.vmem [shape: f32[2,5,20], index: 1, kind: input, shape index: {}]   ;;  %s2935_s2 = inlined_call_operand.hbm [shape: bf16[20,384], index: 2, kind: input, shape index: {}]   ;;  %s2936_s3 = inlined_call_operand.hbm [shape: bf16[128,384], index: 3, kind: input, shape index: {}]   ;;  %s2937_s4 = inlined_call_operand.vmem [shape: f32[1,384], index: 4, kind: input, shape index: {}]   ;;  %s2938_s5 = inlined_call_operand.vmem [shape: f32[1,128], index: 5, kind: input, shape index: {}]   ;;  %s2939_s6 = inlined_call_operand.hbm [shape: bf16[128,384], index: 6, kind: input, shape index: {}]   ;;  %s2940_s7 = inlined_call_operand.hbm [shape: bf16[128,384], index: 7, kind: input, shape index: {}]   ;;  %s2941_s8 = inlined_call_operand.vmem [shape: f32[1,384], index: 8, kind: input, shape index: {}]   ;;  %s2942_s9 = inlined_call_operand.vmem [shape: f32[1,128], index: 9, kind: input, shape index: {}]   ;;  %s2943_s10 = inlined_call_operand.hbm [shape: f32[5,3,20], index: 10, kind: output, shape index: {}]  }
   0x1   :  { %16 = vsyncpa [#allocation6], 0 }
   0x2   :  { %17 = vsyncpa [#allocation9], 0 }
   0x3   :  { %18 = vsyncpa [#allocation4], 0  ;;  %s2253_s13 = smov [#allocation5]   ;;  %s2254_s15 = smov [#allocation2]  }
   0x4   :  { %s40_s14 = sshll.u32 %s2253_s13, 4  ;;  %s28_s16 = sshll.u32 %s2254_s15, 4  ;;  %s41_s14 = int_to_ptr.vmem [resolvable:$true] %s40_s14  ;;  %s2320_s16 = int_to_ptr.vmem [resolvable:$true] %s28_s16 }
   0x5   :  { %s2135_s19 = scalar_lea.hbm %s2936_s3, 3072 }
   0x6   :  { %p2136_p0 = scmp.ne.s32.totalorder %s2936_s3, %s2135_s19  ;;  %p2139_p1 = scmp.lt.u32.totalorder %s2135_s19, %s2936_s3 }
   0x8   :  { %p2141_p2 = pnand %p2139_p1, %p2136_p0 }
   0xa   :  { %2144 = shalt.err (!%p2141_p2)
}
   0xb   :  { %s2145_s24 = scalar_lea.vmem %s41_s14, 3072  ;;  %p2150_p4 = scmp.lt.s32.totalorder %s41_s14, %s41_s14 }
   0xc   :  { %p2146_p3 = scmp.ne.s32.totalorder %s41_s14, %s2145_s24  ;;  %p2151_p5 = scmp.lt.s32.totalorder %s2145_s24, %s2145_s24 }
   0xe   :  { %p2152_p6 = por %p2151_p5, %p2150_p4 }
  0x10   :  { %p2153_p7 = pnand %p2152_p6, %p2146_p3 }
  0x12   :  { %2156 = shalt.err (!%p2153_p7)
}
  0x13   :  { %s2255_s25 = smov 192   ;;  %s2256_s26 = smov 12  }
  0x14   :  { %46 = dma.hbm_to_vmem [thread:$0]  %s2936_s3, 3072, %s41_s14, [#allocation6], %s2255_s25, %s2255_s25, %s2256_s26  }
  0x15   :  { %s2157_s11 = scalar_lea.hbm %s2935_s2, 576 }
  0x16   :  { %p2158_p8 = scmp.ne.s32.totalorder %s2935_s2, %s2157_s11  ;;  %p2161_p9 = scmp.lt.u32.totalorder %s2157_s11, %s2935_s2 }
  0x18   :  { %p2163_p10 = pnand %p2161_p9, %p2158_p8 }
  0x1a   :  { %2166 = shalt.err (!%p2163_p10)
}
  0x1b   :  { %s2167_s18 = scalar_lea.vmem %s2320_s16, 576  ;;  %p2172_p12 = scmp.lt.s32.totalorder %s2320_s16, %s2320_s16 }
  0x1c   :  { %p2168_p11 = scmp.ne.s32.totalorder %s2320_s16, %s2167_s18  ;;  %p2173_p13 = scmp.lt.s32.totalorder %s2167_s18, %s2167_s18 }
  0x1e   :  { %p2174_p0 = por %p2173_p13, %p2172_p12 }
  0x20   :  { %p2175_p1 = pnand %p2174_p0, %p2168_p11 }
  0x22   :  { %2178 = shalt.err (!%p2175_p1)
}
  0x23   :  { %34 = dma.hbm_to_vmem [thread:$0]  %s2935_s2, 576, %s2320_s16, [#allocation3], %s2255_s25, %s2255_s25, %s2256_s26  }
  0x24   :  { %s2257_s19 = smov [#allocation7]   ;;  %s2258_s21 = smov [#allocation8]  }
  0x25   :  { %s56_s20 = sshll.u32 %s2257_s19, 4  ;;  %s68_s22 = sshll.u32 %s2258_s21, 4  ;;  %s57_s20 = int_to_ptr.vmem [resolvable:$true] %s56_s20  ;;  %s2357_s22 = int_to_ptr.vmem [resolvable:$true] %s68_s22 }
  0x26   :  { %s2179_s27 = scalar_lea.hbm %s2939_s6, 3072 }
  0x27   :  { %p2180_p2 = scmp.ne.s32.totalorder %s2939_s6, %s2179_s27  ;;  %p2183_p3 = scmp.lt.u32.totalorder %s2179_s27, %s2939_s6 }
  0x29   :  { %p2185_p4 = pnand %p2183_p3, %p2180_p2 }
  0x2b   :  { %2188 = shalt.err (!%p2185_p4)
}
  0x2c   :  { %s2189_s2 = scalar_lea.vmem %s57_s20, 3072  ;;  %p2194_p6 = scmp.lt.s32.totalorder %s57_s20, %s57_s20 }
  0x2d   :  { %p2190_p5 = scmp.ne.s32.totalorder %s57_s20, %s2189_s2  ;;  %p2195_p7 = scmp.lt.s32.totalorder %s2189_s2, %s2189_s2 }
  0x2f   :  { %p2196_p8 = por %p2195_p7, %p2194_p6 }
  0x31   :  { %p2197_p9 = pnand %p2196_p8, %p2190_p5 }
  0x33   :  { %2200 = shalt.err (!%p2197_p9)
}
  0x34   :  { %62 = dma.hbm_to_vmem [thread:$0]  %s2939_s6, 3072, %s57_s20, [#allocation6], %s2255_s25, %s2255_s25, %s2256_s26  }
  0x35   :  { %s2201_s17 = scalar_lea.hbm %s2940_s7, 3072 }
  0x36   :  { %p2202_p10 = scmp.ne.s32.totalorder %s2940_s7, %s2201_s17  ;;  %p2205_p11 = scmp.lt.u32.totalorder %s2201_s17, %s2940_s7 }
  0x38   :  { %p2207_p12 = pnand %p2205_p11, %p2202_p10 }
  0x3a   :  { %2210 = shalt.err (!%p2207_p12)
}
  0x3b   :  { %s2211_s21 = scalar_lea.vmem %s2357_s22, 3072  ;;  %p2216_p0 = scmp.lt.s32.totalorder %s2357_s22, %s2357_s22 }
  0x3c   :  { %p2212_p13 = scmp.ne.s32.totalorder %s2357_s22, %s2211_s21  ;;  %p2217_p1 = scmp.lt.s32.totalorder %s2211_s21, %s2211_s21 }
  0x3e   :  { %p2218_p2 = por %p2217_p1, %p2216_p0 }
  0x40   :  { %p2219_p3 = pnand %p2218_p2, %p2212_p13 }
  0x42   :  { %2222 = shalt.err (!%p2219_p3)
}
  0x43   :  { %74 = dma.hbm_to_vmem [thread:$0]  %s2940_s7, 3072, %s2357_s22, [#allocation9], %s2255_s25, %s2255_s25, %s2256_s26  }
  0x44   :  { %2245 = dma.done.wait [#allocation3], 576  }
  0x45   :  { %2246 = vsyncadd [#allocation3], 4294966720 }
  0x46   :  { %2247 = dma.done.wait [#allocation6], 6144  }
  0x47   :  { %2248 = vsyncadd [#allocation6], 4294961152 }
  0x48   :  { %2249 = dma.done.wait [#allocation9], 3072  }
  0x49   :  { %2250 = vsyncadd [#allocation9], 4294964224  ;;  %v2259_v0 = vmov 0   ;;  %v2260_v1 = vmov 0.0   ;;  %vm2261_vm0 = vmmov 0   ;;  %vm124_vm1 = vcmask 1041408  }
  0x4a   :  { %235 = vmatprep.mubr.bf16.mxu0 %v2259_v0  ;;  %1824 = vmatprep.subr.bf16.mxu1 %v2260_v1  ;;  %v1984_v2 = vld [vmem:[#allocation2 + $0x4] ss:$12 sps:$4 sm:$0xff]   ;;  %v1986_v3 = vld [vmem:[#allocation2] ss:$12 sps:$4 sm:$0xff]   ;;  %v147_v4 = vld [vmem:[#allocation2 + $0x18] sm:$0x33] }
  0x4b   :  { %1828 = vmatprep.mubr.msk.bf16.mxu1 %vm2261_vm0, %v2260_v1  ;;  %203 = vmatprep.subr.bf16.mxu0 %v1984_v2  ;;  %v1666_v5 = vcombine.high %v147_v4, %v147_v4  ;;  %v1665_v6 = vcombine.low %v147_v4, %v147_v4  ;;  %v2398_v7 = vld [vmem:[#allocation5 + $0x4] ss:$12 sps:$4 sm:$0xff]   ;;  %vm122_vm2 = vcmask 1040384   ;;  %v92_v8 = vld [vmem:[%s2933_s0] sm:$0x7]  ;;  %vm126_vm3 = vcmask 1042432  }
  0x4c   :  { %204 = vmatpush1.bf16.msra.mxu0 %v1986_v3  ;;  %v1658_v9 = vld [vmem:[%s2933_s0 + $0x4] sm:$0x7]  ;;  %v1659_v10 = vld [vmem:[%s2933_s0 + $0x8] sm:$0x7]  ;;  %v1660_v12 = vld [vmem:[%s2933_s0 + $0xc] sm:$0x7]  ;;  %v151_v3 = vlaneseq }
  0x4d   :  { %1668 = vmatprep.subr.msk.bf16.mxu0 %vm124_vm1, %v1666_v5  ;;  %v195_v11 = vsel %vm124_vm1, %v1665_v6, 0  ;;  %v1661_v13 = vld [vmem:[%s2933_s0 + $0x10] sm:$0x7]  ;;  %v102_v14 = vrot.slane %v1658_v9, 7  ;;  %v105_v15 = vrot.slane %v1659_v10, 6  ;;  %v108_v16 = vrot.slane %v1660_v12, 5 }
  0x4e   :  { %v111_v17 = vrot.slane %v1661_v13, 4  ;;  %v114_v18 = vrot.slane %v92_v8, 4  ;;  %v120_v19 = vrot.slane %v1660_v12, 1  ;;  %vm128_vm4 = vcmask 1043456   ;;  %v1995_v26 = vld [vmem:[#allocation2 + $0x8] ss:$12 sps:$4 sm:$0xff]  }
  0x4f   :  { %v123_v20 = vsel %vm122_vm2, %v92_v8, %v102_v14  ;;  %v116_v21 = vrot.slane %v1658_v9, 3  ;;  %vm130_vm5 = vcmask 1044480   ;;  %v118_v23 = vrot.slane %v1659_v10, 2  ;;  %1825 = vmatpush3.bf16.msra.mxu1 %v1995_v26  ;;  %v1999_v31 = vld [vmem:[#allocation2 + $0x20] ss:$0 sps:$4 sm:$0x33]  }
  0x50   :  { %206 = vmatpush1.bf16.msra.mxu0 %v195_v11  ;;  %v125_v22 = vsel %vm124_vm1, %v123_v20, %v105_v15  ;;  %vm132_vm6 = vcmask 1045504   ;;  %v136_v25 = vsel %vm122_vm2, %v120_v19, %v1661_v13  ;;  %vm134_vm7 = vcmask 1046528   ;;  %1826 = vmatprep.subr.bf16.mxu1 %v2260_v1  ;;  %v2431_v37 = vld [vmem:[#allocation5] ss:$12 sps:$4 sm:$0xff]   ;;  %v2434_v39 = vld [vmem:[#allocation5 + $0x1c] ss:$12 sps:$4 sm:$0xff]  }
  0x51   :  { %457 = vmatprep.subr.bf16.mxu0 %v2398_v7  ;;  %v127_v24 = vsel %vm126_vm3, %v125_v22, %v108_v16  ;;  %v137_v28 = vsel %vm124_vm1, %v136_v25, %v92_v8  ;;  %vm190_vm8 = vcmask 162816   ;;  %v201_v36 = vsel %vm124_vm1, %v1999_v31, 0  ;;  %v2436_v41 = vld [vmem:[#allocation5 + $0x8] ss:$12 sps:$4 sm:$0xff]   ;;  %v2440_v42 = vld [vmem:[#allocation5 + $0x18] ss:$12 sps:$4 sm:$0xff]  }
  0x52   :  { %v129_v27 = vsel %vm128_vm4, %v127_v24, %v111_v17  ;;  %v138_v30 = vsel %vm126_vm3, %v137_v28, %v102_v14  ;;  %v2443_v43 = vld [vmem:[#allocation5 + $0x34] ss:$12 sps:$4 sm:$0xff]   ;;  %v2455_v45 = vld [vmem:[#allocation5 + $0x30] ss:$12 sps:$4 sm:$0xff]   ;;  %v2457_v46 = vld [vmem:[#allocation5 + $0x4c] ss:$12 sps:$4 sm:$0xff]  }
  0x53   :  { %v131_v29 = vsel %vm130_vm5, %v129_v27, %v114_v18  ;;  %v139_v33 = vsel %vm128_vm4, %v138_v30, %v105_v15  ;;  %1827 = vmatpush3.bf16.msra.mxu1 %v201_v36  ;;  %v2448_v44 = vld [vmem:[#allocation5 + $0x20] ss:$12 sps:$4 sm:$0xff]   ;;  %v2461_v47 = vld [vmem:[#allocation5 + $0x38] ss:$12 sps:$4 sm:$0xff]   ;;  %v2463_v48 = vld [vmem:[#allocation5 + $0x48] ss:$12 sps:$4 sm:$0xff]  }
  0x54   :  { %v133_v32 = vsel %vm132_vm6, %v131_v29, %v116_v21  ;;  %v140_v35 = vsel %vm130_vm5, %v139_v33, %v108_v16  ;;  %1832 = vmatprep.subr.bf16.mxu1 %v2260_v1  ;;  %v2466_v49 = vld [vmem:[#allocation5 + $0x64] ss:$12 sps:$4 sm:$0xff]   ;;  %v2473_v51 = vld [vmem:[#allocation5 + $0x60] ss:$12 sps:$4 sm:$0xff]   ;;  %v2476_v52 = vld [vmem:[#allocation5 + $0x7c] ss:$12 sps:$4 sm:$0xff]  }
  0x55   :  { %v135_v34 = vsel %vm134_vm7, %v133_v32, %v118_v23  ;;  %v141_v38 = vsel %vm132_vm6, %v140_v35, %v111_v17  ;;  %v2469_v50 = vld [vmem:[#allocation5 + $0x50] ss:$12 sps:$4 sm:$0xff]   ;;  %v2478_v53 = vld [vmem:[#allocation5 + $0x68] ss:$12 sps:$4 sm:$0xff]   ;;  %v2483_v54 = vld [vmem:[#allocation5 + $0x78] ss:$12 sps:$4 sm:$0xff]  }
  0x56   :  { %v142_v40 = vpack.c.bf16 %v141_v38, %v135_v34  ;;  %v2486_v55 = vld [vmem:[#allocation5 + $0x94] ss:$12 sps:$4 sm:$0xff]   ;;  %v2493_v57 = vld [vmem:[#allocation5 + $0x90] ss:$12 sps:$4 sm:$0xff]   ;;  %v2496_v58 = vld [vmem:[#allocation5 + $0xac] ss:$12 sps:$4 sm:$0xff]  }
  0x57   :  { %v2488_v56 = vld [vmem:[#allocation5 + $0x80] ss:$12 sps:$4 sm:$0xff]   ;;  %v2498_v59 = vld [vmem:[#allocation5 + $0x98] ss:$12 sps:$4 sm:$0xff]   ;;  %vm2503_vm9 = vmpackc.low %vm190_vm8, %vm190_vm8  ;;  %v2568_v4 = vshrl.u32 %v151_v3, 7  ;;  %vm1600_vm10 = vcmask 157696  }
  0x58   :  { %1669 = vmatmul.mubr.msk.bf16.vlgmr.msra.gmra.mrb[0].mxu0 %vm190_vm8, %v142_v40  ;;  %1829 = vmatmul.mubr.msk.bf16.vlgmr.msra.gmra.mrb[0].mxu1 %vm190_vm8, %v142_v40  ;;  %v2509_v61 = vld [vmem:[#allocation5 + $0xa8] ss:$12 sps:$4 sm:$0xff]   ;;  %v2514_v62 = vld [vmem:[%s2934_s1] sm:$0x1f] }
  0x59   :  { %458 = vmatpush1.bf16.msra.mxu0 %v2431_v37  ;;  %1833 = vmatpush3.bf16.msra.mxu1 %v2436_v41  ;;  %v2517_v63 = vld [vmem:[#allocation5 + $0xb0] ss:$12 sps:$4 sm:$0xff]   ;;  %v1697_v2 = vpack.c.bf16 %v2514_v62, %v2514_v62  ;;  %v161_v5 = vsub.s32 2, %v2568_v4  ;;  %v153_v6 = vsub.s32 0, %v2568_v4  ;;  %v157_v9 = vsub.s32 1, %v2568_v4 }
  0x5a   :  { %459 = vmatprep.subr.bf16.mxu0 %v2434_v39  ;;  %1834 = vmatprep.subr.bf16.mxu1 %v2260_v1  ;;  %v149_v8 = vld [vmem:[%s2937_s4] sm:$0x7] }
  0x5b   :  { %489 = vmatprep.mubr.bf16.mxu0 %v2259_v0  ;;  %1848 = vmatprep.mubr.msk.bf16.mxu1 %vm2261_vm0, %v2260_v1  ;;  %v162_v11 = vrot.slane %v149_v8, %v161_v5  ;;  %v158_v14 = vrot.slane %v149_v8, %v157_v9  ;;  %v2597_v38 = vld [vmem:[%s2938_s5] ss:$0 sm:$0xff] }
  0x5c   :  { %v844_v60 = vld [vmem:[%s2941_s8] sm:$0x7] }
  0x5d   :  { %460 = vmatpush1.bf16.msra.mxu0 %v2440_v42  ;;  %1835 = vmatpush3.bf16.msra.mxu1 %v2448_v44 }
  0x5e   :  { %461 = vmatprep.subr.bf16.mxu0 %v2443_v43  ;;  %1836 = vmatprep.subr.bf16.mxu1 %v2260_v1 }
  0x61   :  { %462 = vmatpush1.bf16.msra.mxu0 %v2455_v45  ;;  %1837 = vmatpush3.bf16.msra.mxu1 %v2461_v47 }
  0x62   :  { %463 = vmatprep.subr.bf16.mxu0 %v2457_v46  ;;  %1838 = vmatprep.subr.bf16.mxu1 %v2260_v1 }
  0x65   :  { %464 = vmatpush1.bf16.msra.mxu0 %v2463_v48  ;;  %1839 = vmatpush3.bf16.msra.mxu1 %v2469_v50 }
  0x66   :  { %465 = vmatprep.subr.bf16.mxu0 %v2466_v49  ;;  %1840 = vmatprep.subr.bf16.mxu1 %v2260_v1 }
  0x69   :  { %466 = vmatpush1.bf16.msra.mxu0 %v2473_v51  ;;  %1841 = vmatpush3.bf16.msra.mxu1 %v2478_v53 }
  0x6a   :  { %467 = vmatprep.subr.bf16.mxu0 %v2476_v52  ;;  %1842 = vmatprep.subr.bf16.mxu1 %v2260_v1 }
  0x6d   :  { %468 = vmatpush1.bf16.msra.mxu0 %v2483_v54  ;;  %1843 = vmatpush3.bf16.msra.mxu1 %v2488_v56 }
  0x6e   :  { %469 = vmatprep.subr.bf16.mxu0 %v2486_v55  ;;  %1844 = vmatprep.subr.bf16.mxu1 %v2260_v1 }
  0x71   :  { %470 = vmatpush1.bf16.msra.mxu0 %v2493_v57  ;;  %1845 = vmatpush3.bf16.msra.mxu1 %v2498_v59 }
  0x72   :  { %471 = vmatprep.subr.bf16.mxu0 %v2496_v58  ;;  %1846 = vmatprep.subr.bf16.mxu1 %v2260_v1 }
  0x75   :  { %472 = vmatpush1.bf16.msra.mxu0 %v2509_v61  ;;  %1847 = vmatpush3.bf16.msra.mxu1 %v2517_v63 }
  0x76   :  { %557 = vmatprep.subr.bf16.mxu0 %v2398_v7  ;;  %1852 = vmatprep.subr.bf16.mxu1 %v2260_v1 }
  0x78   :  { %1698 = vmatmul.mubr.msk.bf16.vlgmr.msra.gmra.mrb[4].mxu0 %vm2503_vm9, %v1697_v2  ;;  %1849 = vmatmul.mubr.msk.bf16.vlgmr.msra.gmra.mrb[4].mxu1 %vm2503_vm9, %v1697_v2 }
  0x79   :  { %558 = vmatpush1.bf16.msra.mxu0 %v2431_v37  ;;  %1853 = vmatpush3.bf16.msra.mxu1 %v2436_v41 }
  0x7a   :  { %559 = vmatprep.subr.bf16.mxu0 %v2434_v39  ;;  %1854 = vmatprep.subr.bf16.mxu1 %v2260_v1 }
  0x7b   :  { %589 = vmatprep.mubr.bf16.mxu0 %v2259_v0  ;;  %1868 = vmatprep.mubr.msk.bf16.mxu1 %vm2261_vm0, %v2260_v1 }
  0x7d   :  { %560 = vmatpush1.bf16.msra.mxu0 %v2440_v42  ;;  %1855 = vmatpush3.bf16.msra.mxu1 %v2448_v44 }
  0x7e   :  { %561 = vmatprep.subr.bf16.mxu0 %v2443_v43  ;;  %1856 = vmatprep.subr.bf16.mxu1 %v2260_v1 }
  0x81   :  { %562 = vmatpush1.bf16.msra.mxu0 %v2455_v45  ;;  %1857 = vmatpush3.bf16.msra.mxu1 %v2461_v47 }
  0x82   :  { %563 = vmatprep.subr.bf16.mxu0 %v2457_v46  ;;  %1858 = vmatprep.subr.bf16.mxu1 %v2260_v1 }
  0x85   :  { %564 = vmatpush1.bf16.msra.mxu0 %v2463_v48  ;;  %1859 = vmatpush3.bf16.msra.mxu1 %v2469_v50 }
  0x86   :  { %565 = vmatprep.subr.bf16.mxu0 %v2466_v49  ;;  %1860 = vmatprep.subr.bf16.mxu1 %v2260_v1 }
  0x89   :  { %566 = vmatpush1.bf16.msra.mxu0 %v2473_v51  ;;  %1861 = vmatpush3.bf16.msra.mxu1 %v2478_v53 }
  0x8a   :  { %567 = vmatprep.subr.bf16.mxu0 %v2476_v52  ;;  %1862 = vmatprep.subr.bf16.mxu1 %v2260_v1 }
  0x8d   :  { %568 = vmatpush1.bf16.msra.mxu0 %v2483_v54  ;;  %1863 = vmatpush3.bf16.msra.mxu1 %v2488_v56 }
  0x8e   :  { %569 = vmatprep.subr.bf16.mxu0 %v2486_v55  ;;  %1864 = vmatprep.subr.bf16.mxu1 %v2260_v1 }
  0x91   :  { %570 = vmatpush1.bf16.msra.mxu0 %v2493_v57  ;;  %1865 = vmatpush3.bf16.msra.mxu1 %v2498_v59 }
  0x92   :  { %571 = vmatprep.subr.bf16.mxu0 %v2496_v58  ;;  %1866 = vmatprep.subr.bf16.mxu1 %v2260_v1 }
  0x95   :  { %572 = vmatpush1.bf16.msra.mxu0 %v2509_v61  ;;  %1867 = vmatpush3.bf16.msra.mxu1 %v2517_v63 }
  0x96   :  { %695 = vmatprep.subr.bf16.mxu0 %v2398_v7  ;;  %1872 = vmatprep.subr.bf16.mxu1 %v2260_v1  ;;  %v154_v7 = vrot.slane %v149_v8, %v153_v6 }
 0x12b   :  { %v237_v10 = vpop.f32.mrb[0].mxu0  ;;  %v280_v13 = vpop.f32.mrb[0].mxu1 }
 0x12c   :  { %v239_v12 = vpop.f32.mrb[1].mxu0  ;;  %v1830_v16 = vpop.f32.mrb[1].mxu1  ;;  %v2588_v23 = vadd.f32 %v237_v10, %v154_v7  ;;  %v2600_v10 = vadd.f32 %v280_v13, %v162_v11 }
 0x12d   :  { %v241_v15 = vpop.f32.mrb[2].mxu0  ;;  %v283_v19 = vpop.f32.mrb[2].mxu1  ;;  %v2591_v28 = vadd.f32 %v239_v12, %v158_v14 }
 0x12e   :  { %v2582_v17 = vadd.f32 %v241_v15, %v154_v7  ;;  %v243_v18 = vpop.f32.mrb[3].mxu0  ;;  %v2586_v21 = vadd.f32 %v283_v19, %v162_v11  ;;  %v1831_v22 = vpop.f32.mrb[3].mxu1 }
 0x12f   :  { %v2584_v20 = vadd.f32 %v243_v18, %v158_v14  ;;  %v288_v18 = vsel %vm190_vm8, %v2514_v62, 0.0 }
 0x14b   :  { %v491_v24 = vpop.f32.mrb[4].mxu0  ;;  %v532_v27 = vpop.f32.mrb[4].mxu1 }
 0x14c   :  { %v538_v25 = vadd.f32 %v491_v24, %v2588_v23  ;;  %v493_v26 = vpop.f32.mrb[5].mxu0  ;;  %v1850_v30 = vpop.f32.mrb[5].mxu1  ;;  %v548_v3 = vadd.f32 %v2597_v38, %v532_v27 }
 0x14d   :  { %v495_v29 = vpop.f32.mrb[6].mxu0  ;;  %v535_v33 = vpop.f32.mrb[6].mxu1  ;;  %v543_v34 = vadd.f32 %v493_v26, %v2591_v28 }
 0x14e   :  { %v539_v31 = vmul.f32 0.5, %v538_v25  ;;  %v496_v32 = vpop.f32.mrb[7].mxu0  ;;  %v1851_v35 = vpop.f32.mrb[7].mxu1 }
 0x14f   :  { %v544_v36 = vmul.f32 0.5, %v543_v34 }
 0x150   :  { %2087 = vtanh.f32 %v539_v31 }
 0x151   :  { %2089 = vtanh.f32 %v544_v36 }
 0x15a   :  { %v2088_v40 = vpop.eup %2087 }
 0x15b   :  { %v541_v2 = vmul.f32 0.5, %v2088_v40  ;;  %v2090_v12 = vpop.eup %2089 }
 0x15c   :  { %v546_v15 = vmul.f32 0.5, %v2090_v12 }
 0x15d   :  { %v542_v8 = vadd.f32 0.5, %v541_v2 }
 0x15e   :  { %v547_v16 = vadd.f32 0.5, %v546_v15 }
 0x15f   :  { %v549_v7 = vmul.f32 %v548_v3, %v542_v8 }
 0x160   :  { %v552_v19 = vsub.f32 1.0, %v547_v16  ;;  %v554_v24 = vmul.f32 %v547_v16, %v288_v18 }
 0x161   :  { %v550_v14 = vadd.f32 %v549_v7, %v2600_v10 }
 0x163   :  { %2091 = vtanh.f32 %v550_v14 }
 0x16d   :  { %v2092_v22 = vpop.eup %2091 }
 0x16e   :  { %v553_v25 = vmul.f32 %v2092_v22, %v552_v19 }
 0x170   :  { %v2605_v26 = vadd.f32 %v554_v24, %v553_v25 }
 0x172   :  { %v556_v11 = vpack.c.bf16 %v2605_v26, %v2605_v26  ;;  %v679_v2 = vrot.slane %v2605_v26, 3 }
 0x174   :  { %590 = vmatmul.mubr.bf16.vlgmr.msra.gmra.mrb[8].mxu0 %v556_v11  ;;  %1869 = vmatmul.mubr.bf16.vlgmr.msra.gmra.mrb[8].mxu1 %v556_v11 }
 0x175   :  { %696 = vmatpush1.bf16.msra.mxu0 %v2431_v37  ;;  %1873 = vmatpush3.bf16.msra.mxu1 %v2436_v41 }
 0x176   :  { %697 = vmatprep.subr.bf16.mxu0 %v2434_v39  ;;  %1874 = vmatprep.subr.bf16.mxu1 %v2260_v1 }
 0x177   :  { %727 = vmatprep.mubr.bf16.mxu0 %v2259_v0  ;;  %1888 = vmatprep.mubr.msk.bf16.mxu1 %vm2261_vm0, %v2260_v1 }
 0x179   :  { %698 = vmatpush1.bf16.msra.mxu0 %v2440_v42  ;;  %1875 = vmatpush3.bf16.msra.mxu1 %v2448_v44 }
 0x17a   :  { %699 = vmatprep.subr.bf16.mxu0 %v2443_v43  ;;  %1876 = vmatprep.subr.bf16.mxu1 %v2260_v1 }
 0x17d   :  { %700 = vmatpush1.bf16.msra.mxu0 %v2455_v45  ;;  %1877 = vmatpush3.bf16.msra.mxu1 %v2461_v47 }
 0x17e   :  { %701 = vmatprep.subr.bf16.mxu0 %v2457_v46  ;;  %1878 = vmatprep.subr.bf16.mxu1 %v2260_v1 }
 0x181   :  { %702 = vmatpush1.bf16.msra.mxu0 %v2463_v48  ;;  %1879 = vmatpush3.bf16.msra.mxu1 %v2469_v50 }
 0x182   :  { %703 = vmatprep.subr.bf16.mxu0 %v2466_v49  ;;  %1880 = vmatprep.subr.bf16.mxu1 %v2260_v1 }
 0x185   :  { %704 = vmatpush1.bf16.msra.mxu0 %v2473_v51  ;;  %1881 = vmatpush3.bf16.msra.mxu1 %v2478_v53 }
 0x186   :  { %705 = vmatprep.subr.bf16.mxu0 %v2476_v52  ;;  %1882 = vmatprep.subr.bf16.mxu1 %v2260_v1 }
 0x189   :  { %706 = vmatpush1.bf16.msra.mxu0 %v2483_v54  ;;  %1883 = vmatpush3.bf16.msra.mxu1 %v2488_v56 }
 0x18a   :  { %707 = vmatprep.subr.bf16.mxu0 %v2486_v55  ;;  %1884 = vmatprep.subr.bf16.mxu1 %v2260_v1 }
 0x18d   :  { %708 = vmatpush1.bf16.msra.mxu0 %v2493_v57  ;;  %1885 = vmatpush3.bf16.msra.mxu1 %v2498_v59 }
 0x18e   :  { %709 = vmatprep.subr.bf16.mxu0 %v2496_v58  ;;  %1886 = vmatprep.subr.bf16.mxu1 %v2260_v1 }
 0x191   :  { %710 = vmatpush1.bf16.msra.mxu0 %v2509_v61  ;;  %1887 = vmatpush3.bf16.msra.mxu1 %v2517_v63 }
 0x192   :  { %1892 = vmatprep.subr.bf16.mxu1 %v2260_v1 }
 0x247   :  { %v591_v37 = vpop.f32.mrb[8].mxu0  ;;  %v632_v39 = vpop.f32.mrb[8].mxu1 }
 0x248   :  { %v639_v41 = vrot.slane %v591_v37, 3  ;;  %v593_v42 = vpop.f32.mrb[9].mxu0  ;;  %v1870_v43 = vpop.f32.mrb[9].mxu1  ;;  %v664_v57 = vadd.f32 %v2597_v38, %v632_v39  ;;  %v2025_v39 = vld [vmem:[#allocation7 + $0x4] ss:$12 sps:$4 sm:$0xff]  }
 0x249   :  { %v652_v44 = vrot.slane %v593_v42, 3  ;;  %v595_v45 = vpop.f32.mrb[10].mxu0  ;;  %v635_v46 = vpop.f32.mrb[10].mxu1  ;;  %989 = vmatprep.subr.bf16.mxu0 %v2025_v39  ;;  %v2026_v42 = vld [vmem:[#allocation7 + $0x8] ss:$12 sps:$4 sm:$0xff]  }
 0x24a   :  { %v641_v47 = vadd.f32 %v639_v41, %v2588_v23  ;;  %v642_v48 = vadd.f32 %v639_v41, %v2582_v17  ;;  %v596_v49 = vpop.f32.mrb[11].mxu0  ;;  %v1871_v50 = vpop.f32.mrb[11].mxu1  ;;  %v666_v13 = vrot.slane %v664_v57, 3  ;;  %v2023_v41 = vld [vmem:[#allocation7] ss:$12 sps:$4 sm:$0xff]  }
 0x24b   :  { %v654_v53 = vadd.f32 %v652_v44, %v2591_v28  ;;  %v655_v54 = vadd.f32 %v652_v44, %v2584_v20  ;;  %v2029_v43 = vld [vmem:[#allocation7 + $0x1c] ss:$12 sps:$4 sm:$0xff]   ;;  %v2027_v44 = vld [vmem:[#allocation7 + $0x18] ss:$12 sps:$4 sm:$0xff]   ;;  %v2030_v45 = vld [vmem:[#allocation7 + $0x20] ss:$12 sps:$4 sm:$0xff]  }
 0x24c   :  { %v643_v51 = vmul.f32 0.5, %v641_v47  ;;  %v644_v52 = vmul.f32 0.5, %v642_v48  ;;  %v2033_v46 = vld [vmem:[#allocation7 + $0x34] ss:$12 sps:$4 sm:$0xff]   ;;  %v2031_v47 = vld [vmem:[#allocation7 + $0x30] ss:$12 sps:$4 sm:$0xff]  }
 0x24d   :  { %v656_v55 = vmul.f32 0.5, %v654_v53  ;;  %v657_v56 = vmul.f32 0.5, %v655_v54  ;;  %v2034_v48 = vld [vmem:[#allocation7 + $0x38] ss:$12 sps:$4 sm:$0xff]   ;;  %v2035_v50 = vld [vmem:[#allocation7 + $0x48] ss:$12 sps:$4 sm:$0xff]  }
 0x24e   :  { %2093 = vtanh.f32 %v643_v51  ;;  %v2037_v49 = vld [vmem:[#allocation7 + $0x4c] ss:$12 sps:$4 sm:$0xff]   ;;  %v2038_v51 = vld [vmem:[#allocation7 + $0x50] ss:$12 sps:$4 sm:$0xff]   ;;  %v2042_v54 = vld [vmem:[#allocation7 + $0x68] ss:$12 sps:$4 sm:$0xff]  }
 0x24f   :  { %2095 = vtanh.f32 %v644_v52  ;;  %v2041_v52 = vld [vmem:[#allocation7 + $0x64] ss:$12 sps:$4 sm:$0xff]   ;;  %v2039_v53 = vld [vmem:[#allocation7 + $0x60] ss:$12 sps:$4 sm:$0xff]  }
 0x250   :  { %2097 = vtanh.f32 %v656_v55  ;;  %v2045_v55 = vld [vmem:[#allocation7 + $0x7c] ss:$12 sps:$4 sm:$0xff]   ;;  %v2046_v57 = vld [vmem:[#allocation7 + $0x80] ss:$12 sps:$4 sm:$0xff]  }
 0x251   :  { %2099 = vtanh.f32 %v657_v56  ;;  %v2043_v56 = vld [vmem:[#allocation7 + $0x78] ss:$12 sps:$4 sm:$0xff]  }
 0x258   :  { %v2094_v58 = vpop.eup %2093 }
 0x259   :  { %v2096_v59 = vpop.eup %2095  ;;  %v647_v61 = vmul.f32 0.5, %v2094_v58  ;;  %v2049_v58 = vld [vmem:[#allocation7 + $0x94] ss:$12 sps:$4 sm:$0xff]  }
 0x25a   :  { %v648_v62 = vmul.f32 0.5, %v2096_v59  ;;  %v2098_v28 = vpop.eup %2097  ;;  %v2047_v59 = vld [vmem:[#allocation7 + $0x90] ss:$12 sps:$4 sm:$0xff]  }
 0x25b   :  { %v649_v63 = vadd.f32 0.5, %v647_v61  ;;  %v2100_v31 = vpop.eup %2099  ;;  %v660_v33 = vmul.f32 0.5, %v2098_v28  ;;  %v2050_v61 = vld [vmem:[#allocation7 + $0x98] ss:$12 sps:$4 sm:$0xff]  }
 0x25c   :  { %v650_v23 = vadd.f32 0.5, %v648_v62  ;;  %v661_v34 = vmul.f32 0.5, %v2100_v31  ;;  %v2053_v62 = vld [vmem:[#allocation7 + $0xac] ss:$12 sps:$4 sm:$0xff]  }
 0x25d   :  { %v668_v27 = vmul.f32 %v666_v13, %v649_v63  ;;  %v662_v35 = vadd.f32 0.5, %v660_v33  ;;  %v2051_v63 = vld [vmem:[#allocation7 + $0xa8] ss:$12 sps:$4 sm:$0xff]  }
 0x25e   :  { %v669_v29 = vmul.f32 %v666_v13, %v650_v23  ;;  %v663_v36 = vadd.f32 0.5, %v661_v34  ;;  %v2054_v13 = vld [vmem:[#allocation7 + $0xb0] ss:$12 sps:$4 sm:$0xff]  }
 0x25f   :  { %v670_v30 = vadd.f32 %v668_v27, %v2600_v10  ;;  %v674_v40 = vsub.f32 1.0, %v662_v35  ;;  %v681_v14 = vmul.f32 %v679_v2, %v662_v35  ;;  %v2667_v23 = vld [vmem:[#allocation8 + $0x4] ss:$12 sps:$4 sm:$0xff]  }
 0x260   :  { %v671_v32 = vadd.f32 %v669_v29, %v2586_v21  ;;  %v675_v8 = vsub.f32 1.0, %v663_v36  ;;  %v682_v16 = vmul.f32 %v679_v2, %v663_v36 }
 0x261   :  { %2101 = vtanh.f32 %v670_v30 }
 0x262   :  { %2103 = vtanh.f32 %v671_v32 }
 0x26b   :  { %v2102_v3 = vpop.eup %2101 }
 0x26c   :  { %v2104_v7 = vpop.eup %2103  ;;  %v676_v12 = vmul.f32 %v2102_v3, %v674_v40 }
 0x26d   :  { %v677_v15 = vmul.f32 %v2104_v7, %v675_v8 }
 0x26e   :  { %v2651_v10 = vadd.f32 %v681_v14, %v676_v12 }
 0x26f   :  { %v2653_v18 = vadd.f32 %v682_v16, %v677_v15 }
 0x270   :  { %v803_v16 = vrot.slane %v2651_v10, 3 }
 0x271   :  { %v685_v19 = vpack.c.bf16 %v2653_v18, %v2651_v10 }
 0x273   :  { %v687_v22 = vshrl.u32 %v685_v19, 16  ;;  %v690_v24 = vshll.u32 %v685_v19, 16  ;;  %v804_v19 = vrot.slane %v2653_v18, 3 }
 0x275   :  { %v689_v25 = vrot.slane %v687_v22, 2  ;;  %v692_v11 = vrot.slane %v690_v24, 3 }
 0x277   :  { %v693_v37 = vor.u32 %v692_v11, %v689_v25 }
 0x279   :  { %728 = vmatmul.mubr.bf16.vlgmr.msra.gmra.mrb[12].mxu0 %v693_v37  ;;  %1889 = vmatmul.mubr.bf16.vlgmr.msra.gmra.mrb[12].mxu1 %v693_v37 }
 0x27a   :  { %1021 = vmatprep.mubr.bf16.mxu0 %v2259_v0  ;;  %1908 = vmatprep.mubr.msk.bf16.mxu1 %vm2261_vm0, %v2260_v1 }
 0x27b   :  { %990 = vmatpush1.bf16.msra.mxu0 %v2023_v41  ;;  %1893 = vmatpush3.bf16.msra.mxu1 %v2026_v42 }
 0x27c   :  { %1894 = vmatprep.subr.bf16.mxu1 %v2260_v1  ;;  %991 = vmatprep.subr.bf16.mxu0 %v2029_v43 }
 0x27f   :  { %992 = vmatpush1.bf16.msra.mxu0 %v2027_v44  ;;  %1895 = vmatpush3.bf16.msra.mxu1 %v2030_v45  ;;  %v2678_v44 = vld [vmem:[#allocation8] ss:$12 sps:$4 sm:$0xff]   ;;  %v809_v45 = vsel %vm130_vm5, %v2605_v26, %v2651_v10  ;;  %v2703_v10 = vld [vmem:[#allocation8 + $0x30] ss:$12 sps:$4 sm:$0xff]  }
 0x280   :  { %1896 = vmatprep.subr.bf16.mxu1 %v2260_v1  ;;  %993 = vmatprep.subr.bf16.mxu0 %v2033_v46  ;;  %v2696_v26 = vld [vmem:[#allocation8 + $0x34] ss:$12 sps:$4 sm:$0xff]  }
 0x283   :  { %994 = vmatpush1.bf16.msra.mxu0 %v2031_v47  ;;  %1897 = vmatpush3.bf16.msra.mxu1 %v2034_v48  ;;  %v2685_v47 = vld [vmem:[#allocation8 + $0x8] ss:$12 sps:$4 sm:$0xff]  }
 0x284   :  { %1898 = vmatprep.subr.bf16.mxu1 %v2260_v1  ;;  %995 = vmatprep.subr.bf16.mxu0 %v2037_v49  ;;  %v2687_v49 = vld [vmem:[#allocation8 + $0x1c] ss:$12 sps:$4 sm:$0xff]  }
 0x287   :  { %996 = vmatpush1.bf16.msra.mxu0 %v2035_v50  ;;  %1899 = vmatpush3.bf16.msra.mxu1 %v2038_v51  ;;  %v2693_v50 = vld [vmem:[#allocation8 + $0x20] ss:$12 sps:$4 sm:$0xff]  }
 0x288   :  { %1900 = vmatprep.subr.bf16.mxu1 %v2260_v1  ;;  %997 = vmatprep.subr.bf16.mxu0 %v2041_v52  ;;  %v2709_v51 = vld [vmem:[#allocation8 + $0x4c] ss:$12 sps:$4 sm:$0xff]   ;;  %v2713_v52 = vld [vmem:[#allocation8 + $0x48] ss:$12 sps:$4 sm:$0xff]  }
 0x28b   :  { %998 = vmatpush1.bf16.msra.mxu0 %v2039_v53  ;;  %1901 = vmatpush3.bf16.msra.mxu1 %v2042_v54  ;;  %v2716_v53 = vld [vmem:[#allocation8 + $0x50] ss:$12 sps:$4 sm:$0xff]  }
 0x28c   :  { %1902 = vmatprep.subr.bf16.mxu1 %v2260_v1  ;;  %999 = vmatprep.subr.bf16.mxu0 %v2045_v55  ;;  %v2719_v54 = vld [vmem:[#allocation8 + $0x64] ss:$12 sps:$4 sm:$0xff]   ;;  %v2723_v55 = vld [vmem:[#allocation8 + $0x60] ss:$12 sps:$4 sm:$0xff]  }
 0x28f   :  { %1000 = vmatpush1.bf16.msra.mxu0 %v2043_v56  ;;  %1903 = vmatpush3.bf16.msra.mxu1 %v2046_v57  ;;  %v2726_v56 = vld [vmem:[#allocation8 + $0x68] ss:$12 sps:$4 sm:$0xff]  }
 0x290   :  { %1904 = vmatprep.subr.bf16.mxu1 %v2260_v1  ;;  %1001 = vmatprep.subr.bf16.mxu0 %v2049_v58  ;;  %v2729_v57 = vld [vmem:[#allocation8 + $0x7c] ss:$12 sps:$4 sm:$0xff]   ;;  %v2733_v58 = vld [vmem:[#allocation8 + $0x78] ss:$12 sps:$4 sm:$0xff]  }
 0x293   :  { %1002 = vmatpush1.bf16.msra.mxu0 %v2047_v59  ;;  %1905 = vmatpush3.bf16.msra.mxu1 %v2050_v61  ;;  %v2736_v59 = vld [vmem:[#allocation8 + $0x80] ss:$12 sps:$4 sm:$0xff]  }
 0x294   :  { %1906 = vmatprep.subr.bf16.mxu1 %v2260_v1  ;;  %1003 = vmatprep.subr.bf16.mxu0 %v2053_v62  ;;  %v2739_v61 = vld [vmem:[#allocation8 + $0x94] ss:$12 sps:$4 sm:$0xff]   ;;  %v2743_v62 = vld [vmem:[#allocation8 + $0x90] ss:$12 sps:$4 sm:$0xff]  }
 0x297   :  { %1004 = vmatpush1.bf16.msra.mxu0 %v2051_v63  ;;  %1907 = vmatpush3.bf16.msra.mxu1 %v2054_v13  ;;  %v2746_v63 = vld [vmem:[#allocation8 + $0x98] ss:$12 sps:$4 sm:$0xff]  }
 0x298   :  { %1244 = vmatprep.subr.bf16.mxu0 %v2667_v23  ;;  %1912 = vmatprep.subr.bf16.mxu1 %v2260_v1  ;;  %v2749_v13 = vld [vmem:[#allocation8 + $0xac] ss:$12 sps:$4 sm:$0xff]  }
 0x34c   :  { %v729_v27 = vpop.f32.mrb[12].mxu0  ;;  %v770_v29 = vpop.f32.mrb[12].mxu1 }
 0x34d   :  { %v777_v28 = vrot.slane %v729_v27, 6  ;;  %v731_v30 = vpop.f32.mrb[13].mxu0  ;;  %v1890_v31 = vpop.f32.mrb[13].mxu1  ;;  %v792_v7 = vadd.f32 %v2597_v38, %v770_v29  ;;  %v2753_v27 = vld [vmem:[#allocation8 + $0xa8] ss:$12 sps:$4 sm:$0xff]  }
 0x34e   :  { %v785_v32 = vrot.slane %v731_v30, 6  ;;  %v733_v33 = vpop.f32.mrb[14].mxu0  ;;  %v773_v34 = vpop.f32.mrb[14].mxu1  ;;  %v2758_v29 = vld [vmem:[%s2934_s1 + $0x8] sm:$0x1f] }
 0x34f   :  { %v779_v35 = vadd.f32 %v777_v28, %v2582_v17  ;;  %v734_v36 = vpop.f32.mrb[15].mxu0  ;;  %v1891_v40 = vpop.f32.mrb[15].mxu1  ;;  %v794_v17 = vrot.slane %v792_v7, 6  ;;  %v2761_v28 = vld [vmem:[#allocation8 + $0xb0] ss:$12 sps:$4 sm:$0xff]   ;;  %v1753_v30 = vpack.c.bf16 %v2758_v29, %v2758_v29  ;;  %v849_v33 = vrot.slane %v844_v60, %v153_v6 }
 0x350   :  { %v787_v2 = vadd.f32 %v785_v32, %v2584_v20  ;;  %v805_v20 = vsel %vm130_vm5, %v803_v16, %v804_v19  ;;  %v857_v34 = vrot.slane %v844_v60, %v161_v5  ;;  %v853_v40 = vrot.slane %v844_v60, %v157_v9 }
 0x351   :  { %v780_v3 = vmul.f32 0.5, %v779_v35 }
 0x352   :  { %v788_v8 = vmul.f32 0.5, %v787_v2 }
 0x353   :  { %2105 = vtanh.f32 %v780_v3 }
 0x354   :  { %2107 = vtanh.f32 %v788_v8 }
 0x35d   :  { %v2106_v12 = vpop.eup %2105 }
 0x35e   :  { %v2108_v14 = vpop.eup %2107  ;;  %v782_v15 = vmul.f32 0.5, %v2106_v12 }
 0x35f   :  { %v790_v22 = vmul.f32 0.5, %v2108_v14 }
 0x360   :  { %v783_v24 = vadd.f32 0.5, %v782_v15 }
 0x361   :  { %v791_v25 = vadd.f32 0.5, %v790_v22 }
 0x362   :  { %v796_v11 = vmul.f32 %v794_v17, %v783_v24 }
 0x363   :  { %v807_v37 = vmul.f32 %v805_v20, %v791_v25  ;;  %v799_v41 = vsub.f32 1.0, %v791_v25 }
 0x364   :  { %v797_v39 = vadd.f32 %v796_v11, %v2586_v21  ;;  %v2690_v21 = vld [vmem:[#allocation8 + $0x18] ss:$12 sps:$4 sm:$0xff]  }
 0x366   :  { %2109 = vtanh.f32 %v797_v39  ;;  %v2834_v39 = vld [vmem:[%s2942_s9] ss:$0 sm:$0xff]  ;;  %s2262_s9 = smov [#allocation10]  }
 0x367   :  { %s1644_s18 = sshll.u32 %s2262_s9, 4  ;;  %s1645_s18 = int_to_ptr.vmem [resolvable:$true] %s1644_s18 }
 0x368   :  { %s2223_s3 = scalar_lea.vmem %s1645_s18, 320  ;;  %p2228_p5 = scmp.lt.s32.totalorder %s1645_s18, %s1645_s18 }
 0x369   :  { %p2224_p4 = scmp.ne.s32.totalorder %s1645_s18, %s2223_s3  ;;  %p2229_p6 = scmp.lt.s32.totalorder %s2223_s3, %s2223_s3 }
 0x36b   :  { %p2230_p7 = por %p2229_p6, %p2228_p5 }
 0x36d   :  { %p2231_p8 = pnand %p2230_p7, %p2224_p4 }
 0x370   :  { %v2110_v38 = vpop.eup %2109 }
 0x371   :  { %v800_v42 = vmul.f32 %v2110_v38, %v799_v41 }
 0x373   :  { %v808_v43 = vadd.f32 %v807_v37, %v800_v42 }
 0x375   :  { %v810_v46 = vsel %vm124_vm1, %v2653_v18, %v808_v43  ;;  %v2706_v18 = vld [vmem:[#allocation8 + $0x38] ss:$12 sps:$4 sm:$0xff]  }
 0x376   :  { %v811_v48 = vpack.c.bf16 %v810_v46, %v809_v45 }
 0x378   :  { %1022 = vmatmul.mubr.bf16.vlgmr.msra.gmra.mrb[16].mxu0 %v811_v48  ;;  %1909 = vmatmul.mubr.bf16.vlgmr.msra.gmra.mrb[16].mxu1 %v811_v48 }
 0x379   :  { %1245 = vmatpush1.bf16.msra.mxu0 %v2678_v44  ;;  %1913 = vmatpush3.bf16.msra.mxu1 %v2685_v47 }
 0x37a   :  { %1246 = vmatprep.subr.bf16.mxu0 %v2687_v49  ;;  %1914 = vmatprep.subr.bf16.mxu1 %v2260_v1 }
 0x37b   :  { %1276 = vmatprep.mubr.bf16.mxu0 %v2259_v0  ;;  %1928 = vmatprep.mubr.msk.bf16.mxu1 %vm2261_vm0, %v2260_v1 }
 0x37d   :  { %1247 = vmatpush1.bf16.msra.mxu0 %v2690_v21  ;;  %1915 = vmatpush3.bf16.msra.mxu1 %v2693_v50 }
 0x37e   :  { %1248 = vmatprep.subr.bf16.mxu0 %v2696_v26  ;;  %1916 = vmatprep.subr.bf16.mxu1 %v2260_v1 }
 0x381   :  { %1249 = vmatpush1.bf16.msra.mxu0 %v2703_v10  ;;  %1917 = vmatpush3.bf16.msra.mxu1 %v2706_v18 }
 0x382   :  { %1250 = vmatprep.subr.bf16.mxu0 %v2709_v51  ;;  %1918 = vmatprep.subr.bf16.mxu1 %v2260_v1 }
 0x385   :  { %1251 = vmatpush1.bf16.msra.mxu0 %v2713_v52  ;;  %1919 = vmatpush3.bf16.msra.mxu1 %v2716_v53 }
 0x386   :  { %1252 = vmatprep.subr.bf16.mxu0 %v2719_v54  ;;  %1920 = vmatprep.subr.bf16.mxu1 %v2260_v1 }
 0x389   :  { %1253 = vmatpush1.bf16.msra.mxu0 %v2723_v55  ;;  %1921 = vmatpush3.bf16.msra.mxu1 %v2726_v56 }
 0x38a   :  { %1254 = vmatprep.subr.bf16.mxu0 %v2729_v57  ;;  %1922 = vmatprep.subr.bf16.mxu1 %v2260_v1 }
 0x38d   :  { %1255 = vmatpush1.bf16.msra.mxu0 %v2733_v58  ;;  %1923 = vmatpush3.bf16.msra.mxu1 %v2736_v59 }
 0x38e   :  { %1256 = vmatprep.subr.bf16.mxu0 %v2739_v61  ;;  %1924 = vmatprep.subr.bf16.mxu1 %v2260_v1 }
 0x391   :  { %1257 = vmatpush1.bf16.msra.mxu0 %v2743_v62  ;;  %1925 = vmatpush3.bf16.msra.mxu1 %v2746_v63 }
 0x392   :  { %1258 = vmatprep.subr.bf16.mxu0 %v2749_v13  ;;  %1926 = vmatprep.subr.bf16.mxu1 %v2260_v1 }
 0x395   :  { %1259 = vmatpush1.bf16.msra.mxu0 %v2753_v27  ;;  %1927 = vmatpush3.bf16.msra.mxu1 %v2761_v28 }
 0x396   :  { %1344 = vmatprep.subr.bf16.mxu0 %v2667_v23  ;;  %1932 = vmatprep.subr.bf16.mxu1 %v2260_v1 }
 0x398   :  { %1754 = vmatmul.mubr.msk.bf16.vlgmr.msra.gmra.mrb[20].mxu0 %vm2503_vm9, %v1753_v30  ;;  %1929 = vmatmul.mubr.msk.bf16.vlgmr.msra.gmra.mrb[20].mxu1 %vm2503_vm9, %v1753_v30 }
 0x399   :  { %1345 = vmatpush1.bf16.msra.mxu0 %v2678_v44  ;;  %1933 = vmatpush3.bf16.msra.mxu1 %v2685_v47 }
 0x39a   :  { %1346 = vmatprep.subr.bf16.mxu0 %v2687_v49  ;;  %1934 = vmatprep.subr.bf16.mxu1 %v2260_v1 }
 0x39b   :  { %1376 = vmatprep.mubr.bf16.mxu0 %v2259_v0  ;;  %1948 = vmatprep.mubr.msk.bf16.mxu1 %vm2261_vm0, %v2260_v1 }
 0x39d   :  { %1347 = vmatpush1.bf16.msra.mxu0 %v2690_v21  ;;  %1935 = vmatpush3.bf16.msra.mxu1 %v2693_v50 }
 0x39e   :  { %1348 = vmatprep.subr.bf16.mxu0 %v2696_v26  ;;  %1936 = vmatprep.subr.bf16.mxu1 %v2260_v1 }
 0x3a1   :  { %1349 = vmatpush1.bf16.msra.mxu0 %v2703_v10  ;;  %1937 = vmatpush3.bf16.msra.mxu1 %v2706_v18 }
 0x3a2   :  { %1350 = vmatprep.subr.bf16.mxu0 %v2709_v51  ;;  %1938 = vmatprep.subr.bf16.mxu1 %v2260_v1 }
 0x3a5   :  { %1351 = vmatpush1.bf16.msra.mxu0 %v2713_v52  ;;  %1939 = vmatpush3.bf16.msra.mxu1 %v2716_v53 }
 0x3a6   :  { %1352 = vmatprep.subr.bf16.mxu0 %v2719_v54  ;;  %1940 = vmatprep.subr.bf16.mxu1 %v2260_v1 }
 0x3a9   :  { %1353 = vmatpush1.bf16.msra.mxu0 %v2723_v55  ;;  %1941 = vmatpush3.bf16.msra.mxu1 %v2726_v56 }
 0x3aa   :  { %1354 = vmatprep.subr.bf16.mxu0 %v2729_v57  ;;  %1942 = vmatprep.subr.bf16.mxu1 %v2260_v1 }
 0x3ad   :  { %1355 = vmatpush1.bf16.msra.mxu0 %v2733_v58  ;;  %1943 = vmatpush3.bf16.msra.mxu1 %v2736_v59 }
 0x3ae   :  { %1356 = vmatprep.subr.bf16.mxu0 %v2739_v61  ;;  %1944 = vmatprep.subr.bf16.mxu1 %v2260_v1 }
 0x3b1   :  { %1357 = vmatpush1.bf16.msra.mxu0 %v2743_v62  ;;  %1945 = vmatpush3.bf16.msra.mxu1 %v2746_v63 }
 0x3b2   :  { %1358 = vmatprep.subr.bf16.mxu0 %v2749_v13  ;;  %1946 = vmatprep.subr.bf16.mxu1 %v2260_v1 }
 0x3b5   :  { %1359 = vmatpush1.bf16.msra.mxu0 %v2753_v27  ;;  %1947 = vmatpush3.bf16.msra.mxu1 %v2761_v28 }
 0x3b6   :  { %1482 = vmatprep.subr.bf16.mxu0 %v2667_v23  ;;  %1952 = vmatprep.subr.bf16.mxu1 %v2260_v1 }
 0x44b   :  { %v1023_v31 = vpop.f32.mrb[16].mxu0  ;;  %v1066_v32 = vpop.f32.mrb[16].mxu1 }
 0x44c   :  { %v1025_v35 = vpop.f32.mrb[17].mxu0  ;;  %v1910_v36 = vpop.f32.mrb[17].mxu1  ;;  %v2825_v15 = vadd.f32 %v1023_v31, %v849_v33  ;;  %v2837_v45 = vadd.f32 %v1066_v32, %v857_v34 }
 0x44d   :  { %v1027_v23 = vpop.f32.mrb[18].mxu0  ;;  %v1069_v2 = vpop.f32.mrb[18].mxu1  ;;  %v2828_v4 = vadd.f32 %v1025_v35, %v853_v40 }
 0x44e   :  { %v2819_v3 = vadd.f32 %v1027_v23, %v849_v33  ;;  %v2821_v8 = vadd.f32 %v1069_v2, %v857_v34  ;;  %v1029_v7 = vpop.f32.mrb[19].mxu0  ;;  %v1911_v12 = vpop.f32.mrb[19].mxu1  ;;  %v1075_v33 = vsel %vm190_vm8, %v2758_v29, 0.0 }
 0x44f   :  { %v2823_v14 = vadd.f32 %v1029_v7, %v853_v40 }
 0x46b   :  { %v1278_v6 = vpop.f32.mrb[20].mxu0  ;;  %v1319_v16 = vpop.f32.mrb[20].mxu1 }
 0x46c   :  { %v1325_v5 = vadd.f32 %v1278_v6, %v2825_v15  ;;  %v1280_v19 = vpop.f32.mrb[21].mxu0  ;;  %v1930_v22 = vpop.f32.mrb[21].mxu1  ;;  %v1335_v42 = vadd.f32 %v2834_v39, %v1319_v16 }
 0x46d   :  { %v1282_v9 = vpop.f32.mrb[22].mxu0  ;;  %v1322_v24 = vpop.f32.mrb[22].mxu1  ;;  %v1330_v20 = vadd.f32 %v1280_v19, %v2828_v4 }
 0x46e   :  { %v1326_v17 = vmul.f32 0.5, %v1325_v5  ;;  %v1283_v25 = vpop.f32.mrb[23].mxu0  ;;  %v1931_v11 = vpop.f32.mrb[23].mxu1 }
 0x46f   :  { %v1331_v37 = vmul.f32 0.5, %v1330_v20 }
 0x470   :  { %2111 = vtanh.f32 %v1326_v17 }
 0x471   :  { %2113 = vtanh.f32 %v1331_v37 }
 0x47a   :  { %v2112_v41 = vpop.eup %2111 }
 0x47b   :  { %v1328_v38 = vmul.f32 0.5, %v2112_v41  ;;  %v2114_v48 = vpop.eup %2113 }
 0x47c   :  { %v1333_v60 = vmul.f32 0.5, %v2114_v48 }
 0x47d   :  { %v1329_v43 = vadd.f32 0.5, %v1328_v38 }
 0x47e   :  { %v1334_v31 = vadd.f32 0.5, %v1333_v60 }
 0x47f   :  { %v1336_v46 = vmul.f32 %v1335_v42, %v1329_v43 }
 0x480   :  { %v1339_v35 = vsub.f32 1.0, %v1334_v31  ;;  %v1341_v40 = vmul.f32 %v1334_v31, %v1075_v33 }
 0x481   :  { %v1337_v30 = vadd.f32 %v1336_v46, %v2837_v45 }
 0x483   :  { %2115 = vtanh.f32 %v1337_v30 }
 0x48d   :  { %v2116_v36 = vpop.eup %2115 }
 0x48e   :  { %v1340_v23 = vmul.f32 %v2116_v36, %v1339_v35 }
 0x490   :  { %v2842_v2 = vadd.f32 %v1341_v40, %v1340_v23 }
 0x492   :  { %v1343_v32 = vpack.c.bf16 %v2842_v2, %v2842_v2  ;;  %v1466_v24 = vrot.slane %v2842_v2, 3 }
 0x494   :  { %1377 = vmatmul.mubr.bf16.vlgmr.msra.gmra.mrb[24].mxu0 %v1343_v32  ;;  %1949 = vmatmul.mubr.bf16.vlgmr.msra.gmra.mrb[24].mxu1 %v1343_v32 }
 0x495   :  { %1483 = vmatpush1.bf16.msra.mxu0 %v2678_v44  ;;  %1953 = vmatpush3.bf16.msra.mxu1 %v2685_v47 }
 0x496   :  { %1484 = vmatprep.subr.bf16.mxu0 %v2687_v49  ;;  %1954 = vmatprep.subr.bf16.mxu1 %v2260_v1 }
 0x497   :  { %1514 = vmatprep.mubr.bf16.mxu0 %v2259_v0  ;;  %1968 = vmatprep.mubr.msk.bf16.mxu1 %vm2261_vm0, %v2260_v1 }
 0x499   :  { %1485 = vmatpush1.bf16.msra.mxu0 %v2690_v21  ;;  %1955 = vmatpush3.bf16.msra.mxu1 %v2693_v50 }
 0x49a   :  { %1486 = vmatprep.subr.bf16.mxu0 %v2696_v26  ;;  %1956 = vmatprep.subr.bf16.mxu1 %v2260_v1 }
 0x49d   :  { %1487 = vmatpush1.bf16.msra.mxu0 %v2703_v10  ;;  %1957 = vmatpush3.bf16.msra.mxu1 %v2706_v18 }
 0x49e   :  { %1488 = vmatprep.subr.bf16.mxu0 %v2709_v51  ;;  %1958 = vmatprep.subr.bf16.mxu1 %v2260_v1 }
 0x4a1   :  { %1489 = vmatpush1.bf16.msra.mxu0 %v2713_v52  ;;  %1959 = vmatpush3.bf16.msra.mxu1 %v2716_v53 }
 0x4a2   :  { %1490 = vmatprep.subr.bf16.mxu0 %v2719_v54  ;;  %1960 = vmatprep.subr.bf16.mxu1 %v2260_v1 }
 0x4a5   :  { %1491 = vmatpush1.bf16.msra.mxu0 %v2723_v55  ;;  %1961 = vmatpush3.bf16.msra.mxu1 %v2726_v56 }
 0x4a6   :  { %1492 = vmatprep.subr.bf16.mxu0 %v2729_v57  ;;  %1962 = vmatprep.subr.bf16.mxu1 %v2260_v1 }
 0x4a9   :  { %1493 = vmatpush1.bf16.msra.mxu0 %v2733_v58  ;;  %1963 = vmatpush3.bf16.msra.mxu1 %v2736_v59 }
 0x4aa   :  { %1494 = vmatprep.subr.bf16.mxu0 %v2739_v61  ;;  %1964 = vmatprep.subr.bf16.mxu1 %v2260_v1 }
 0x4ad   :  { %1495 = vmatpush1.bf16.msra.mxu0 %v2743_v62  ;;  %1965 = vmatpush3.bf16.msra.mxu1 %v2746_v63 }
 0x4ae   :  { %1496 = vmatprep.subr.bf16.mxu0 %v2749_v13  ;;  %1966 = vmatprep.subr.bf16.mxu1 %v2260_v1 }
 0x4b1   :  { %1497 = vmatpush1.bf16.msra.mxu0 %v2753_v27  ;;  %1967 = vmatpush3.bf16.msra.mxu1 %v2761_v28 }
 0x567   :  { %v1378_v0 = vpop.f32.mrb[24].mxu0  ;;  %v1419_v44 = vpop.f32.mrb[24].mxu1 }
 0x568   :  { %v1426_v47 = vrot.slane %v1378_v0, 3  ;;  %v1380_v49 = vpop.f32.mrb[25].mxu0  ;;  %v1950_v21 = vpop.f32.mrb[25].mxu1  ;;  %v1451_v59 = vadd.f32 %v2834_v39, %v1419_v44 }
 0x569   :  { %v1439_v50 = vrot.slane %v1380_v49, 3  ;;  %v1382_v26 = vpop.f32.mrb[26].mxu0  ;;  %v1422_v10 = vpop.f32.mrb[26].mxu1 }
 0x56a   :  { %v1428_v18 = vadd.f32 %v1426_v47, %v2825_v15  ;;  %v1429_v51 = vadd.f32 %v1426_v47, %v2819_v3  ;;  %v1383_v52 = vpop.f32.mrb[27].mxu0  ;;  %v1951_v53 = vpop.f32.mrb[27].mxu1  ;;  %v1453_v29 = vrot.slane %v1451_v59, 3 }
 0x56b   :  { %v1441_v55 = vadd.f32 %v1439_v50, %v2828_v4  ;;  %v1442_v56 = vadd.f32 %v1439_v50, %v2823_v14 }
 0x56c   :  { %v1430_v54 = vmul.f32 0.5, %v1428_v18  ;;  %v1431_v1 = vmul.f32 0.5, %v1429_v51 }
 0x56d   :  { %v1443_v57 = vmul.f32 0.5, %v1441_v55  ;;  %v1444_v58 = vmul.f32 0.5, %v1442_v56 }
 0x56e   :  { %2117 = vtanh.f32 %v1430_v54 }
 0x56f   :  { %2119 = vtanh.f32 %v1431_v1 }
 0x570   :  { %2121 = vtanh.f32 %v1443_v57 }
 0x571   :  { %2123 = vtanh.f32 %v1444_v58 }
 0x578   :  { %v2118_v61 = vpop.eup %2117 }
 0x579   :  { %v2120_v62 = vpop.eup %2119  ;;  %v1434_v63 = vmul.f32 0.5, %v2118_v61 }
 0x57a   :  { %v1435_v13 = vmul.f32 0.5, %v2120_v62  ;;  %v2122_v12 = vpop.eup %2121 }
 0x57b   :  { %v1436_v27 = vadd.f32 0.5, %v1434_v63  ;;  %v2124_v6 = vpop.eup %2123  ;;  %v1447_v5 = vmul.f32 0.5, %v2122_v12 }
 0x57c   :  { %v1437_v28 = vadd.f32 0.5, %v1435_v13  ;;  %v1448_v19 = vmul.f32 0.5, %v2124_v6  ;;  %v1613_v6 = vrot.slane %v2842_v2, 2 }
 0x57d   :  { %v1455_v34 = vmul.f32 %v1453_v29, %v1436_v27  ;;  %v1449_v22 = vadd.f32 0.5, %v1447_v5 }
 0x57e   :  { %v1456_v7 = vmul.f32 %v1453_v29, %v1437_v28  ;;  %v1450_v4 = vadd.f32 0.5, %v1448_v19 }
 0x57f   :  { %v1457_v15 = vadd.f32 %v1455_v34, %v2837_v45  ;;  %v1461_v9 = vsub.f32 1.0, %v1449_v22  ;;  %v1468_v37 = vmul.f32 %v1466_v24, %v1449_v22 }
 0x580   :  { %v1458_v16 = vadd.f32 %v1456_v7, %v2821_v8  ;;  %v1462_v25 = vsub.f32 1.0, %v1450_v4  ;;  %v1469_v38 = vmul.f32 %v1466_v24, %v1450_v4  ;;  %v1631_v7 = vrot.slane %v2842_v2, 4 }
 0x581   :  { %2125 = vtanh.f32 %v1457_v15 }
 0x582   :  { %2127 = vtanh.f32 %v1458_v16 }
 0x58b   :  { %v2126_v17 = vpop.eup %2125 }
 0x58c   :  { %v2128_v11 = vpop.eup %2127  ;;  %v1463_v20 = vmul.f32 %v2126_v17, %v1461_v9 }
 0x58d   :  { %v1464_v41 = vmul.f32 %v2128_v11, %v1462_v25 }
 0x58e   :  { %v2887_v42 = vadd.f32 %v1468_v37, %v1463_v20 }
 0x58f   :  { %v1471_v43 = vadd.f32 %v1469_v38, %v1464_v41 }
 0x590   :  { %v1590_v45 = vrot.slane %v2887_v42, 3  ;;  %v1596_v29 = vrot.slane %v2887_v42, 4  ;;  %v1604_v34 = vrot.slane %v2887_v42, 5 }
 0x591   :  { %v1623_v46 = vrot.slane %v1471_v43, 7  ;;  %v1472_v48 = vpack.c.bf16 %v1471_v43, %v2887_v42  ;;  %v1591_v30 = vrot.slane %v1471_v43, 3  ;;  %v1635_v4 = vsel %vm122_vm2, %v1631_v7, %v1471_v43 }
 0x592   :  { %v1598_v15 = vsel %vm122_vm2, %v2842_v2, %v1596_v29 }
 0x593   :  { %v2892_v60 = vsel %vm122_vm2, %v1466_v24, %v1623_v46  ;;  %v1474_v31 = vshrl.u32 %v1472_v48, 16  ;;  %v1477_v33 = vshll.u32 %v1472_v48, 16  ;;  %v1592_v35 = vsel %vm130_vm5, %v1590_v45, %v1591_v30 }
 0x595   :  { %v1476_v36 = vrot.slane %v1474_v31, 2  ;;  %v1479_v40 = vrot.slane %v1477_v33, 3 }
 0x597   :  { %v1480_v23 = vor.u32 %v1479_v40, %v1476_v36 }
 0x599   :  { %1515 = vmatmul.mubr.bf16.vlgmr.msra.gmra.mrb[28].mxu0 %v1480_v23  ;;  %1969 = vmatmul.mubr.bf16.vlgmr.msra.gmra.mrb[28].mxu1 %v1480_v23 }
 0x66c   :  { %v1516_v32 = vpop.f32.mrb[28].mxu0  ;;  %v1557_v0 = vpop.f32.mrb[28].mxu1 }
 0x66d   :  { %v1564_v44 = vrot.slane %v1516_v32, 6  ;;  %v1518_v47 = vpop.f32.mrb[29].mxu0  ;;  %v1970_v49 = vpop.f32.mrb[29].mxu1  ;;  %v1579_v1 = vadd.f32 %v2834_v39, %v1557_v0  ;;  %v1615_v39 = vrot.slane %v2887_v42, 6 }
 0x66e   :  { %v1572_v21 = vrot.slane %v1518_v47, 6  ;;  %v1520_v50 = vpop.f32.mrb[30].mxu0  ;;  %v1560_v26 = vpop.f32.mrb[30].mxu1 }
 0x66f   :  { %v1566_v10 = vadd.f32 %v1564_v44, %v2819_v3  ;;  %v1521_v18 = vpop.f32.mrb[31].mxu0  ;;  %v1971_v51 = vpop.f32.mrb[31].mxu1  ;;  %v1581_v61 = vrot.slane %v1579_v1, 6  ;;  %v1619_v17 = vsel %vm122_vm2, %v1613_v6, %v1615_v39 }
 0x670   :  { %v1574_v52 = vadd.f32 %v1572_v21, %v2823_v14 }
 0x671   :  { %v1567_v53 = vmul.f32 0.5, %v1566_v10 }
 0x672   :  { %v1575_v54 = vmul.f32 0.5, %v1574_v52 }
 0x673   :  { %2129 = vtanh.f32 %v1567_v53 }
 0x674   :  { %2131 = vtanh.f32 %v1575_v54 }
 0x67d   :  { %v2130_v55 = vpop.eup %2129 }
 0x67e   :  { %v2132_v56 = vpop.eup %2131  ;;  %v1569_v57 = vmul.f32 0.5, %v2130_v55 }
 0x67f   :  { %v1577_v58 = vmul.f32 0.5, %v2132_v56 }
 0x680   :  { %v1570_v59 = vadd.f32 0.5, %v1569_v57 }
 0x681   :  { %v1578_v62 = vadd.f32 0.5, %v1577_v58 }
 0x682   :  { %v1583_v63 = vmul.f32 %v1581_v61, %v1570_v59 }
 0x683   :  { %v1594_v13 = vmul.f32 %v1592_v35, %v1578_v62  ;;  %v1586_v27 = vsub.f32 1.0, %v1578_v62 }
 0x684   :  { %v1584_v3 = vadd.f32 %v1583_v63, %v2821_v8  ;;  %v1602_v8 = vrot.slane %v2842_v2, 1 }
 0x686   :  { %2133 = vtanh.f32 %v1584_v3  ;;  %v1609_v24 = vsel %vm122_vm2, %v1602_v8, %v1604_v34 }
 0x690   :  { %v2134_v14 = vpop.eup %2133 }
 0x691   :  { %v1587_v28 = vmul.f32 %v2134_v14, %v1586_v27 }
 0x693   :  { %v1595_v12 = vadd.f32 %v1594_v13, %v1587_v28 }
 0x695   :  { %v1607_v16 = vrot.slane %v1595_v12, 1  ;;  %v1617_v5 = vrot.slane %v1595_v12, 2  ;;  %v1625_v19 = vrot.slane %v1595_v12, 3  ;;  %v1633_v22 = vrot.slane %v1595_v12, 4 }
 0x696   :  { %v1599_v9 = vsel %vm124_vm1, %v1598_v15, %v1595_v12 }
 0x697   :  { %1601 = vst.msk [vmem:[#allocation10] sm:$0x7] %vm1600_vm10, %v1599_v9  ;;  %v1610_v25 = vsel %vm124_vm1, %v1609_v24, %v1607_v16  ;;  %v1620_v11 = vsel %vm124_vm1, %v1619_v17, %v1617_v5  ;;  %v1628_v2 = vsel %vm124_vm1, %v2892_v60, %v1625_v19  ;;  %v1636_v20 = vsel %vm124_vm1, %v1635_v4, %v1633_v22 }
 0x698   :  { %1612 = vst.msk [vmem:[#allocation10 + $0x4] sm:$0x7] %vm1600_vm10, %v1610_v25  ;;  %1622 = vst.msk [vmem:[#allocation10 + $0x8] sm:$0x7] %vm1600_vm10, %v1620_v11 }
 0x699   :  { %1630 = vst.msk [vmem:[#allocation10 + $0xc] sm:$0x7] %vm1600_vm10, %v1628_v2  ;;  %1638 = vst.msk [vmem:[#allocation10 + $0x10] sm:$0x7] %vm1600_vm10, %v1636_v20 }
 0x69a   :  { %2234 = shalt.err (!%p2231_p8)
}
 0x69b   :  { %s2235_s21 = scalar_lea.hbm %s2943_s10, 320 }
 0x69c   :  { %p2236_p9 = scmp.ne.s32.totalorder %s2943_s10, %s2235_s21  ;;  %p2239_p10 = scmp.lt.u32.totalorder %s2235_s21, %s2943_s10 }
 0x69e   :  { %p2241_p11 = pnand %p2239_p10, %p2236_p9 }
 0x6a0   :  { %2244 = shalt.err (!%p2241_p11)
}
 0x6a1   :  { %s2263_s26 = smov 64   ;;  %s2264_s22 = smov 4  }
 0x6a2   :  { %1650 = dma.vmem_to_hbm [thread:$0]  %s1645_s18, 320, %s2943_s10, [#allocation4], %s2263_s26, %s2263_s26, %s2264_s22  }
 0x6a3   :  { %2251 = dma.done.wait [#allocation4], 320  }
 0x6a4   :  { %2252 = vsyncadd [#allocation4], 4294966976 }
 0x6a5   :  { %1654 = vsyncpa [#allocation3], 1 }
 0x6a6   :  { %1655 = vsyncpa [#allocation6], 1 }
 0x6a7   :  { %1656 = vsyncpa [#allocation9], 1 }
 0x6a8   :  { %1657 = vsyncpa [#allocation4], 1 }

</bundles_post_ra>
